<compile_context>
chip_gen: v6e
topology: v6e:2x2x1
jax: 0.10.0
libtpu: 0.0.40
codegen_flags: <defaults>
</compile_context>

<pallas_src>
import functools

import jax
import jax.numpy as jnp
from jax import lax
from jax.experimental import pallas as pl
from jax.experimental.pallas import tpu as pltpu


# ----------------------------------------------------------------------------
# Kernels
# ----------------------------------------------------------------------------
def _sigmoid(x):
    return 1.0 / (1.0 + jnp.exp(-x))


def _lstm_chunk_kernel(hidden_dim, t_chunk,
                       gx_ref, whh_ref, h_out_ref, h_sc, c_sc):
    """One grid step == t_chunk LSTM time steps for one batch shard.

    gx_ref   : (t_chunk, Bs, 4H) precomputed x@W_ih + (b_ih+b_hh), f32
    whh_ref  : (H, 4H)           fused hidden->gate weights (gate order i,f,g,o)
    h_out_ref: (t_chunk, Bs, H)  hidden states for this chunk (weight_dtype)
    h_sc/c_sc: (Bs, H)           recurrent state (f32), carried over time axis
    """
    H = hidden_dim

    @pl.when(pl.program_id(1) == 0)          # first time-chunk of this shard
    def _():
        h_sc[...] = jnp.zeros_like(h_sc)
        c_sc[...] = jnp.zeros_like(c_sc)

    whh = whh_ref[...]                        # (H, 4H), resident across steps

    def step(tt, carry):
        gates = gx_ref[tt] + jnp.dot(h_sc[...].astype(whh.dtype), whh,
                                     preferred_element_type=jnp.float32)
        i_g = _sigmoid(gates[:, 0 * H:1 * H])
        f_g = _sigmoid(gates[:, 1 * H:2 * H])
        g_g = jnp.tanh(gates[:, 2 * H:3 * H])
        o_g = _sigmoid(gates[:, 3 * H:4 * H])
        c_new = f_g * c_sc[...] + i_g * g_g
        h_new = o_g * jnp.tanh(c_new)
        c_sc[...] = c_new
        h_sc[...] = h_new
        h_out_ref[tt] = h_new.astype(h_out_ref.dtype)
        return carry

    lax.fori_loop(0, t_chunk, step, 0, unroll=True)


def _matmul_bias_kernel(x_ref, w_ref, b_ref, o_ref):
    """Tiled (tile_m, K) @ (K, tile_n) + bias, f32 accumulation."""
    acc = jnp.dot(x_ref[...], w_ref[...], preferred_element_type=jnp.float32)
    o_ref[...] = (acc + b_ref[...]).astype(o_ref.dtype)


# ----------------------------------------------------------------------------
# Wrapper
# ----------------------------------------------------------------------------
def _round_up(x, m):
    return -(-x // m) * m


def _pick_sublane_tile(dim, preferred):
    t = preferred
    while t >= 8:
        if dim % t == 0:
            return t
        t //= 2
    return dim            # full dim (always legal)


def _pick_lane_tile(dim, preferred):
    t = preferred
    while t >= 128:
        if dim % t == 0:
            return t
        t //= 2
    return dim            # full dim (always legal)


def deep_recommender_forward(x, params, *, t_chunk=16,
                             weight_dtype=jnp.float32,
                             logits_dtype=jnp.float32):
    """x: int32 (B, S) item ids.  Returns (B, S, V) logits in logits_dtype."""
    emb_table = params["embedding"]       # (V, E), row 0 zero (padding_idx=0)
    w_ih = params["w_ih"]                 # (4H, E)  torch nn.LSTM weight_ih_l0
    w_hh = params["w_hh"]                 # (4H, H)  torch nn.LSTM weight_hh_l0
    b_ih = params["b_ih"]                 # (4H,)
    b_hh = params["b_hh"]                 # (4H,)
    w_fc = params["w_fc"]                 # (V, H)   torch nn.Linear weight
    b_fc = params["b_fc"]                 # (V,)

    B, S = x.shape
    V, E = emb_table.shape
    H = w_hh.shape[1]

    sub = 16 if jnp.dtype(weight_dtype).itemsize < 4 else 8
    H_pad = _round_up(H, 128)             # lane-aligned gate blocks / h stores
    V_pad = _round_up(V, 256)             # lane/MXU-aligned vocab tiles
    B_pad = _round_up(max(B, sub), sub)
    t_chunk = max(1, min(t_chunk, _round_up(S, 8)))
    S_pad = _round_up(S, t_chunk)

    # ---- fused + H-padded gate weights (torch gate order i,f,g,o) ----------
    def pack_gates(w, in_dim, in_pad):
        # (4H, in_dim) torch layout -> (in_pad, 4*H_pad) fused, zero-padded.
        w4 = w.reshape(4, H, in_dim)
        w4 = jnp.pad(w4, ((0, 0), (0, H_pad - H), (0, in_pad - in_dim)))
        return jnp.transpose(w4, (2, 0, 1)).reshape(in_pad, 4 * H_pad) \
                  .astype(weight_dtype)

    wih_all = pack_gates(w_ih, E, E)                                # (E, 4H_pad)
    whh_all = pack_gates(w_hh, H, H_pad)                            # (H_pad, 4H_pad)
    b_all = jnp.pad((b_ih + b_hh).reshape(4, H),
                    ((0, 0), (0, H_pad - H))).reshape(1, 4 * H_pad) \
               .astype(jnp.float32)                                 # (1, 4H_pad)

    # ---- embedding gather in time-major layout (cast table before gather) --
    emb_t = emb_table.astype(weight_dtype)[x.T]                     # (S, B, E)
    emb_t = jnp.pad(emb_t, ((0, S_pad - S), (0, B_pad - B), (0, 0)))

    # ---- hoisted input projection: gates_x = emb @ W_ih + b (parallel) -----
    Mx = S_pad * B_pad
    emb2d = emb_t.reshape(Mx, E)
    tm_x = _pick_sublane_tile(Mx, 256)
    tn_x = _pick_lane_tile(4 * H_pad, 512)

    gx2d = pl.pallas_call(
        _matmul_bias_kernel,
        out_shape=jax.ShapeDtypeStruct((Mx, 4 * H_pad), jnp.float32),
        grid_spec=pltpu.PrefetchScalarGridSpec(
            num_scalar_prefetch=0,
            grid=(Mx // tm_x, (4 * H_pad) // tn_x),
            in_specs=[
                pl.BlockSpec((tm_x, E), lambda i, j: (i, 0)),
                pl.BlockSpec((E, tn_x), lambda i, j: (0, j)),
                pl.BlockSpec((1, tn_x), lambda i, j: (0, j)),
            ],
            out_specs=pl.BlockSpec((tm_x, tn_x), lambda i, j: (i, j)),
        ),
        compiler_params=pltpu.CompilerParams(
            dimension_semantics=("parallel", "parallel")),
    )(emb2d, wih_all, b_all)
    gx = gx2d.reshape(S_pad, B_pad, 4 * H_pad)

    # ---- serial LSTM recurrence (h @ W_hh only), batch-sharded across TCs --
    n_bshards = 2 if (B_pad % (2 * sub) == 0) else 1
    b_shard = B_pad // n_bshards
    num_chunks = S_pad // t_chunk

    hs = pl.pallas_call(
        functools.partial(_lstm_chunk_kernel, H_pad, t_chunk),
        out_shape=jax.ShapeDtypeStruct((S_pad, B_pad, H_pad), weight_dtype),
        grid_spec=pltpu.PrefetchScalarGridSpec(
            num_scalar_prefetch=0,
            grid=(n_bshards, num_chunks),
            in_specs=[
                pl.BlockSpec((t_chunk, b_shard, 4 * H_pad),
                             lambda b, t: (t, b, 0)),
                pl.BlockSpec((H_pad, 4 * H_pad), lambda b, t: (0, 0)),
            ],
            out_specs=pl.BlockSpec((t_chunk, b_shard, H_pad),
                                   lambda b, t: (t, b, 0)),
            scratch_shapes=[pltpu.VMEM((b_shard, H_pad), jnp.float32),
                            pltpu.VMEM((b_shard, H_pad), jnp.float32)],
        ),
        compiler_params=pltpu.CompilerParams(
            dimension_semantics=("parallel", "arbitrary")),  # batch || , time serial
    )(gx, whh_all)

    # ---- vocab projection as a fully-parallel tiled matmul ------------------
    hs = hs[:S, :B, :]                                     # drop padding
    h2d = jnp.transpose(hs, (1, 0, 2)).reshape(B * S, H_pad)  # already weight_dtype
    M = B * S
    M_pad = _round_up(M, sub)
    if M_pad != M:
        h2d = jnp.pad(h2d, ((0, M_pad - M), (0, 0)))

    wfc_t = jnp.pad(w_fc, ((0, V_pad - V), (0, H_pad - H))).T \
               .astype(weight_dtype)                       # (H_pad, V_pad)
    bfc = jnp.pad(b_fc, (0, V_pad - V)).astype(jnp.float32)[None, :]

    tile_m = _pick_sublane_tile(M_pad, 512)
    tile_v = _pick_lane_tile(V_pad, 512)

    logits2d = pl.pallas_call(
        _matmul_bias_kernel,
        out_shape=jax.ShapeDtypeStruct((M_pad, V_pad), logits_dtype),
        grid_spec=pltpu.PrefetchScalarGridSpec(
            num_scalar_prefetch=0,
            grid=(M_pad // tile_m, V_pad // tile_v),
            in_specs=[
                pl.BlockSpec((tile_m, H_pad), lambda i, j: (i, 0)),
                pl.BlockSpec((H_pad, tile_v), lambda i, j: (0, j)),
                pl.BlockSpec((1, tile_v), lambda i, j: (0, j)),
            ],
            out_specs=pl.BlockSpec((tile_m, tile_v), lambda i, j: (i, j)),
        ),
        compiler_params=pltpu.CompilerParams(
            dimension_semantics=("parallel", "parallel")),
    )(h2d, wfc_t, bfc)

    return logits2d[:M, :V].reshape(B, S, V)


# ----------------------------------------------------------------------------
# Pure-JAX reference (torch semantics) for validation
# ----------------------------------------------------------------------------
def reference_forward(x, params):
    emb = params["embedding"][x]                   # (B, S, E)
    B, S, E = emb.shape
    H = params["w_hh"].shape[1]
    w_ih, w_hh = params["w_ih"], params["w_hh"]
    b = params["b_ih"] + params["b_hh"]

    def step(carry, x_t):
        h, c = carry
        gates = x_t @ w_ih.T + h @ w_hh.T + b
        i = jax.nn.sigmoid(gates[:, 0:H])
        f = jax.nn.sigmoid(gates[:, H:2 * H])
        g = jnp.tanh(gates[:, 2 * H:3 * H])
        o = jax.nn.sigmoid(gates[:, 3 * H:4 * H])
        c = f * c + i * g
        h = o * jnp.tanh(c)
        return (h, c), h

    init = (jnp.zeros((B, H), jnp.float32), jnp.zeros((B, H), jnp.float32))
    _, hs = jax.lax.scan(step, init, jnp.transpose(emb, (1, 0, 2)))
    hs = jnp.transpose(hs, (1, 0, 2))              # (B, S, H)
    return hs @ params["w_fc"].T + params["b_fc"]


def init_params(key, num_items, embedding_dim, hidden_dim):
    V = num_items + 1
    E, H = embedding_dim, hidden_dim
    ks = jax.random.split(key, 7)
    k_lstm = 1.0 / jnp.sqrt(H)
    emb = jax.random.normal(ks[0], (V, E), jnp.float32)
    emb = emb.at[0].set(0.0)                       # padding_idx=0
    return {
        "embedding": emb,
        "w_ih": jax.random.uniform(ks[1], (4 * H, E), jnp.float32, -k_lstm, k_lstm),
        "w_hh": jax.random.uniform(ks[2], (4 * H, H), jnp.float32, -k_lstm, k_lstm),
        "b_ih": jax.random.uniform(ks[3], (4 * H,), jnp.float32, -k_lstm, k_lstm),
        "b_hh": jax.random.uniform(ks[4], (4 * H,), jnp.float32, -k_lstm, k_lstm),
        "w_fc": jax.random.uniform(ks[5], (V, H), jnp.float32, -k_lstm, k_lstm),
        "b_fc": jax.random.uniform(ks[6], (V,), jnp.float32, -k_lstm, k_lstm),
    }


if __name__ == "__main__":
    # Small shapes consistent with the module's forward:
    #   x: (batch=2, seq=8) item ids in [0, num_items]
    num_items = 63          # vocab = num_items + 1 = 64
    embedding_dim = 32
    hidden_dim = 32
    B, S = 2, 8

    key = jax.random.PRNGKey(0)
    k_param, k_x = jax.random.split(key)
    params = init_params(k_param, num_items, embedding_dim, hidden_dim)
    x = jax.random.randint(k_x, (B, S), 0, num_items + 1, dtype=jnp.int32)

    ref = reference_forward(x, params)

    # f32 path: exact parity with the f32 reference.
    fwd_f32 = jax.jit(functools.partial(deep_recommender_forward, params=params,
                                        weight_dtype=jnp.float32))
    out = fwd_f32(x)
    jax.block_until_ready(out)
    assert out.shape == (B, S, num_items + 1)
    assert jnp.allclose(out, ref, atol=1e-4, rtol=1e-4), "f32 mismatch vs reference"

    # bf16 weights/activations path (MXU-peak dtype), f32 accumulation.
    fwd_bf16 = jax.jit(functools.partial(deep_recommender_forward, params=params,
                                         weight_dtype=jnp.bfloat16))
    out_bf16 = fwd_bf16(x)
    jax.block_until_ready(out_bf16)
    assert jnp.allclose(out_bf16.astype(jnp.float32), ref, atol=1e-1, rtol=1e-1), \
        "bf16 mismatch vs reference"

    # TODO(synk): predict_next_items (softmax + top-k) is inference glue, left in plain JAX if needed.
    print("KERNEL_OK")
</pallas_src>

<mosaic_0001>
module attributes {stable_mosaic.version = 11 : i64} {
  func.func @_matmul_bias_kernel(%arg0: i32, %arg1: i32, %arg2: memref<64x32xf32, #tpu.memory_space<vmem>>, %arg3: memref<32x512xf32, #tpu.memory_space<vmem>>, %arg4: memref<1x512xf32, #tpu.memory_space<vmem>>, %arg5: memref<64x512xf32, #tpu.memory_space<vmem>>) attributes {dimension_semantics = [#tpu.dimension_semantics<parallel>, #tpu.dimension_semantics<parallel>], iteration_bounds = array<i64: 1, 1>, scalar_prefetch = 0 : i64, scratch_operands = 0 : i64, tpu.core_type = #tpu.core_type<tc>, window_params = [{transform_indices = @transform_0, window_bounds = array<i64: 64, 32>}, {transform_indices = @transform_1, window_bounds = array<i64: 32, 512>}, {transform_indices = @transform_2, window_bounds = array<i64: 1, 512>}, {transform_indices = @transform_3, window_bounds = array<i64: 64, 512>}]} {
    %c0 = arith.constant 0 : index
    %c0_0 = arith.constant 0 : index
    %0 = vector.load %arg2[%c0, %c0_0] : memref<64x32xf32, #tpu.memory_space<vmem>>, vector<64x32xf32>
    %c0_1 = arith.constant 0 : index
    %c0_2 = arith.constant 0 : index
    %1 = vector.load %arg3[%c0_1, %c0_2] : memref<32x512xf32, #tpu.memory_space<vmem>>, vector<32x512xf32>
    %cst = arith.constant dense<0.000000e+00> : vector<64x512xf32>
    %2 = tpu.matmul %0, %1, %cst {dimension_numbers = #tpu.dot_dimension_numbers<[1], [0], [0], [1], [0, 0, 1, 1], [], []>} : vector<64x32xf32>, vector<32x512xf32>, vector<64x512xf32> -> vector<64x512xf32>
    %c0_3 = arith.constant 0 : index
    %c0_4 = arith.constant 0 : index
    %3 = vector.load %arg4[%c0_3, %c0_4] : memref<1x512xf32, #tpu.memory_space<vmem>>, vector<1x512xf32>
    %4 = vector.broadcast %3 : vector<1x512xf32> to vector<64x512xf32>
    %5 = arith.addf %2, %4 : vector<64x512xf32>
    %c0_5 = arith.constant 0 : index
    %c0_6 = arith.constant 0 : index
    %6 = vector.load %arg5[%c0_5, %c0_6] : memref<64x512xf32, #tpu.memory_space<vmem>>, vector<64x512xf32>
    tpu.vector_store %arg5[%c0_5, %c0_6], %5 {strides = array<i32>} : memref<64x512xf32, #tpu.memory_space<vmem>>, vector<64x512xf32>,
    return
  }
  func.func @transform_0(%arg0: i32, %arg1: i32) -> (i32, i32) {
    %c0_i32 = arith.constant 0 : i32
    %c0_i32_0 = arith.constant 0 : i32
    return %arg0, %c0_i32 : i32, i32
  }
  func.func @transform_1(%arg0: i32, %arg1: i32) -> (i32, i32) {
    %c0_i32 = arith.constant 0 : i32
    %c0_i32_0 = arith.constant 0 : i32
    return %c0_i32, %arg1 : i32, i32
  }
  func.func @transform_2(%arg0: i32, %arg1: i32) -> (i32, i32) {
    %c0_i32 = arith.constant 0 : i32
    %c0_i32_0 = arith.constant 0 : i32
    return %c0_i32, %arg1 : i32, i32
  }
  func.func @transform_3(%arg0: i32, %arg1: i32) -> (i32, i32) {
    %c0_i32 = arith.constant 0 : i32
    return %arg0, %arg1 : i32, i32
  }
}

module attributes {stable_mosaic.version = 11 : i64} {
  func.func @_matmul_bias_kernel(%arg0: i32, %arg1: i32, %arg2: memref<16x128xf32, #tpu.memory_space<vmem>>, %arg3: memref<128x256xf32, #tpu.memory_space<vmem>>, %arg4: memref<1x256xf32, #tpu.memory_space<vmem>>, %arg5: memref<16x256xf32, #tpu.memory_space<vmem>>) attributes {dimension_semantics = [#tpu.dimension_semantics<parallel>, #tpu.dimension_semantics<parallel>], iteration_bounds = array<i64: 1, 1>, scalar_prefetch = 0 : i64, scratch_operands = 0 : i64, tpu.core_type = #tpu.core_type<tc>, window_params = [{transform_indices = @transform_0, window_bounds = array<i64: 16, 128>}, {transform_indices = @transform_1, window_bounds = array<i64: 128, 256>}, {transform_indices = @transform_2, window_bounds = array<i64: 1, 256>}, {transform_indices = @transform_3, window_bounds = array<i64: 16, 256>}]} {
    %c0 = arith.constant 0 : index
    %c0_0 = arith.constant 0 : index
    %0 = vector.load %arg2[%c0, %c0_0] : memref<16x128xf32, #tpu.memory_space<vmem>>, vector<16x128xf32>
    %c0_1 = arith.constant 0 : index
    %c0_2 = arith.constant 0 : index
    %1 = vector.load %arg3[%c0_1, %c0_2] : memref<128x256xf32, #tpu.memory_space<vmem>>, vector<128x256xf32>
    %cst = arith.constant dense<0.000000e+00> : vector<16x256xf32>
    %2 = tpu.matmul %0, %1, %cst {dimension_numbers = #tpu.dot_dimension_numbers<[1], [0], [0], [1], [0, 0, 1, 1], [], []>} : vector<16x128xf32>, vector<128x256xf32>, vector<16x256xf32> -> vector<16x256xf32>
    %c0_3 = arith.constant 0 : index
    %c0_4 = arith.constant 0 : index
    %3 = vector.load %arg4[%c0_3, %c0_4] : memref<1x256xf32, #tpu.memory_space<vmem>>, vector<1x256xf32>
    %4 = vector.broadcast %3 : vector<1x256xf32> to vector<16x256xf32>
    %5 = arith.addf %2, %4 : vector<16x256xf32>
    %c0_5 = arith.constant 0 : index
    %c0_6 = arith.constant 0 : index
    %6 = vector.load %arg5[%c0_5, %c0_6] : memref<16x256xf32, #tpu.memory_space<vmem>>, vector<16x256xf32>
    tpu.vector_store %arg5[%c0_5, %c0_6], %5 {strides = array<i32>} : memref<16x256xf32, #tpu.memory_space<vmem>>, vector<16x256xf32>,
    return
  }
  func.func @transform_0(%arg0: i32, %arg1: i32) -> (i32, i32) {
    %c0_i32 = arith.constant 0 : i32
    %c0_i32_0 = arith.constant 0 : i32
    return %arg0, %c0_i32 : i32, i32
  }
  func.func @transform_1(%arg0: i32, %arg1: i32) -> (i32, i32) {
    %c0_i32 = arith.constant 0 : i32
    %c0_i32_0 = arith.constant 0 : i32
    return %c0_i32, %arg1 : i32, i32
  }
  func.func @transform_2(%arg0: i32, %arg1: i32) -> (i32, i32) {
    %c0_i32 = arith.constant 0 : i32
    %c0_i32_0 = arith.constant 0 : i32
    return %c0_i32, %arg1 : i32, i32
  }
  func.func @transform_3(%arg0: i32, %arg1: i32) -> (i32, i32) {
    %c0_i32 = arith.constant 0 : i32
    return %arg0, %arg1 : i32, i32
  }
}

module attributes {stable_mosaic.version = 11 : i64} {
  func.func @_lstm_chunk_kernel(%arg0: i32, %arg1: i32, %arg2: memref<8x8x512xf32, #tpu.memory_space<vmem>>, %arg3: memref<128x512xf32, #tpu.memory_space<vmem>>, %arg4: memref<8x8x128xf32, #tpu.memory_space<vmem>>, %arg5: memref<8x128xf32, #tpu.memory_space<vmem>>, %arg6: memref<8x128xf32, #tpu.memory_space<vmem>>) attributes {dimension_semantics = [#tpu.dimension_semantics<parallel>, #tpu.dimension_semantics<arbitrary>], iteration_bounds = array<i64: 1, 1>, scalar_prefetch = 0 : i64, scratch_operands = 2 : i64, tpu.core_type = #tpu.core_type<tc>, window_params = [{transform_indices = @transform_0, window_bounds = array<i64: 8, 8, 512>}, {pipeline_mode = #tpu.pipeline_mode<synchronous>, transform_indices = @transform_1, window_bounds = array<i64: 128, 512>}, {transform_indices = @transform_2, window_bounds = array<i64: 8, 8, 128>}]} {
    %c0_i32 = arith.constant 0 : i32
    %0 = arith.cmpi eq, %arg1, %c0_i32 : i32
    %1 = arith.extui %0 : i1 to i32
    %c0_i32_0 = arith.constant 0 : i32
    %2 = arith.cmpi ne, %1, %c0_i32_0 : i32
    scf.if %2 {
      %cst_178 = arith.constant 0.000000e+00 : f32
      %356 = vector.broadcast %cst_178 : f32 to vector<8x128xf32>
      %c0_179 = arith.constant 0 : index
      %c0_180 = arith.constant 0 : index
      %357 = vector.load %arg5[%c0_179, %c0_180] : memref<8x128xf32, #tpu.memory_space<vmem>>, vector<8x128xf32>
      tpu.vector_store %arg5[%c0_179, %c0_180], %356 {strides = array<i32>} : memref<8x128xf32, #tpu.memory_space<vmem>>, vector<8x128xf32>,
      %cst_181 = arith.constant 0.000000e+00 : f32
      %358 = vector.broadcast %cst_181 : f32 to vector<8x128xf32>
      %c0_182 = arith.constant 0 : index
      %c0_183 = arith.constant 0 : index
      %359 = vector.load %arg6[%c0_182, %c0_183] : memref<8x128xf32, #tpu.memory_space<vmem>>, vector<8x128xf32>
      tpu.vector_store %arg6[%c0_182, %c0_183], %358 {strides = array<i32>} : memref<8x128xf32, #tpu.memory_space<vmem>>, vector<8x128xf32>,
    } else {
    }
    %c0 = arith.constant 0 : index
    %c0_1 = arith.constant 0 : index
    %3 = vector.load %arg3[%c0, %c0_1] : memref<128x512xf32, #tpu.memory_space<vmem>>, vector<128x512xf32>
    %c0_i32_2 = arith.constant 0 : i32
    %4 = arith.index_cast %c0_i32_2 : i32 to index
    %c0_3 = arith.constant 0 : index
    %c0_4 = arith.constant 0 : index
    %5 = vector.load %arg2[%4, %c0_3, %c0_4] : memref<8x8x512xf32, #tpu.memory_space<vmem>>, vector<1x8x512xf32>
    %6 = vector.shape_cast %5 : vector<1x8x512xf32> to vector<8x512xf32>
    %c0_5 = arith.constant 0 : index
    %c0_6 = arith.constant 0 : index
    %7 = vector.load %arg5[%c0_5, %c0_6] : memref<8x128xf32, #tpu.memory_space<vmem>>, vector<8x128xf32>
    %cst = arith.constant dense<0.000000e+00> : vector<8x512xf32>
    %8 = tpu.matmul %7, %3, %cst {dimension_numbers = #tpu.dot_dimension_numbers<[1], [0], [0], [1], [0, 0, 1, 1], [], []>} : vector<8x128xf32>, vector<128x512xf32>, vector<8x512xf32> -> vector<8x512xf32>
    %9 = arith.addf %6, %8 : vector<8x512xf32>
    %10 = vector.extract_strided_slice %9 {offsets = [0, 0], sizes = [8, 128], strides = [1, 1]} : vector<8x512xf32> to vector<8x128xf32>
    %cst_7 = arith.constant 0.000000e+00 : f32
    %11 = vector.broadcast %cst_7 : f32 to vector<8x128xf32>
    %12 = arith.subf %11, %10 : vector<8x128xf32>
    %13 = math.exp %12 : vector<8x128xf32>
    %cst_8 = arith.constant 1.000000e+00 : f32
    %14 = vector.broadcast %cst_8 : f32 to vector<8x128xf32>
    %15 = arith.addf %14, %13 : vector<8x128xf32>
    %cst_9 = arith.constant 1.000000e+00 : f32
    %16 = vector.broadcast %cst_9 : f32 to vector<8x128xf32>
    %17 = arith.divf %16, %15 : vector<8x128xf32>
    %18 = vector.extract_strided_slice %9 {offsets = [0, 128], sizes = [8, 128], strides = [1, 1]} : vector<8x512xf32> to vector<8x128xf32>
    %cst_10 = arith.constant 0.000000e+00 : f32
    %19 = vector.broadcast %cst_10 : f32 to vector<8x128xf32>
    %20 = arith.subf %19, %18 : vector<8x128xf32>
    %21 = math.exp %20 : vector<8x128xf32>
    %cst_11 = arith.constant 1.000000e+00 : f32
    %22 = vector.broadcast %cst_11 : f32 to vector<8x128xf32>
    %23 = arith.addf %22, %21 : vector<8x128xf32>
    %cst_12 = arith.constant 1.000000e+00 : f32
    %24 = vector.broadcast %cst_12 : f32 to vector<8x128xf32>
    %25 = arith.divf %24, %23 : vector<8x128xf32>
    %26 = vector.extract_strided_slice %9 {offsets = [0, 256], sizes = [8, 128], strides = [1, 1]} : vector<8x512xf32> to vector<8x128xf32>
    %27 = math.tanh %26 : vector<8x128xf32>
    %28 = vector.extract_strided_slice %9 {offsets = [0, 384], sizes = [8, 128], strides = [1, 1]} : vector<8x512xf32> to vector<8x128xf32>
    %cst_13 = arith.constant 0.000000e+00 : f32
    %29 = vector.broadcast %cst_13 : f32 to vector<8x128xf32>
    %30 = arith.subf %29, %28 : vector<8x128xf32>
    %31 = math.exp %30 : vector<8x128xf32>
    %cst_14 = arith.constant 1.000000e+00 : f32
    %32 = vector.broadcast %cst_14 : f32 to vector<8x128xf32>
    %33 = arith.addf %32, %31 : vector<8x128xf32>
    %cst_15 = arith.constant 1.000000e+00 : f32
    %34 = vector.broadcast %cst_15 : f32 to vector<8x128xf32>
    %35 = arith.divf %34, %33 : vector<8x128xf32>
    %c0_16 = arith.constant 0 : index
    %c0_17 = arith.constant 0 : index
    %36 = vector.load %arg6[%c0_16, %c0_17] : memref<8x128xf32, #tpu.memory_space<vmem>>, vector<8x128xf32>
    %37 = arith.mulf %25, %36 : vector<8x128xf32>
    %38 = arith.mulf %17, %27 : vector<8x128xf32>
    %39 = arith.addf %37, %38 : vector<8x128xf32>
    %40 = math.tanh %39 : vector<8x128xf32>
    %41 = arith.mulf %35, %40 : vector<8x128xf32>
    %c0_18 = arith.constant 0 : index
    %c0_19 = arith.constant 0 : index
    %42 = vector.load %arg6[%c0_18, %c0_19] : memref<8x128xf32, #tpu.memory_space<vmem>>, vector<8x128xf32>
    tpu.vector_store %arg6[%c0_18, %c0_19], %39 {strides = array<i32>} : memref<8x128xf32, #tpu.memory_space<vmem>>, vector<8x128xf32>,
    %c0_20 = arith.constant 0 : index
    %c0_21 = arith.constant 0 : index
    %43 = vector.load %arg5[%c0_20, %c0_21] : memref<8x128xf32, #tpu.memory_space<vmem>>, vector<8x128xf32>
    tpu.vector_store %arg5[%c0_20, %c0_21], %41 {strides = array<i32>} : memref<8x128xf32, #tpu.memory_space<vmem>>, vector<8x128xf32>,
    %44 = arith.index_cast %c0_i32_2 : i32 to index
    %c0_22 = arith.constant 0 : index
    %c0_23 = arith.constant 0 : index
    %45 = vector.load %arg4[%44, %c0_22, %c0_23] : memref<8x8x128xf32, #tpu.memory_space<vmem>>, vector<1x8x128xf32>
    %46 = vector.shape_cast %45 : vector<1x8x128xf32> to vector<8x128xf32>
    %47 = vector.shape_cast %41 : vector<8x128xf32> to vector<1x8x128xf32>
    tpu.vector_store %arg4[%44, %c0_22, %c0_23], %47 {strides = array<i32>} : memref<8x8x128xf32, #tpu.memory_space<vmem>>, vector<1x8x128xf32>,
    %c1_i32 = arith.constant 1 : i32
    %48 = arith.index_cast %c1_i32 : i32 to index
    %c0_24 = arith.constant 0 : index
    %c0_25 = arith.constant 0 : index
    %49 = vector.load %arg2[%48, %c0_24, %c0_25] : memref<8x8x512xf32, #tpu.memory_space<vmem>>, vector<1x8x512xf32>
    %50 = vector.shape_cast %49 : vector<1x8x512xf32> to vector<8x512xf32>
    %c0_26 = arith.constant 0 : index
    %c0_27 = arith.constant 0 : index
    %51 = vector.load %arg5[%c0_26, %c0_27] : memref<8x128xf32, #tpu.memory_space<vmem>>, vector<8x128xf32>
    %cst_28 = arith.constant dense<0.000000e+00> : vector<8x512xf32>
    %52 = tpu.matmul %51, %3, %cst_28 {dimension_numbers = #tpu.dot_dimension_numbers<[1], [0], [0], [1], [0, 0, 1, 1], [], []>} : vector<8x128xf32>, vector<128x512xf32>, vector<8x512xf32> -> vector<8x512xf32>
    %53 = arith.addf %50, %52 : vector<8x512xf32>
    %54 = vector.extract_strided_slice %53 {offsets = [0, 0], sizes = [8, 128], strides = [1, 1]} : vector<8x512xf32> to vector<8x128xf32>
    %cst_29 = arith.constant 0.000000e+00 : f32
    %55 = vector.broadcast %cst_29 : f32 to vector<8x128xf32>
    %56 = arith.subf %55, %54 : vector<8x128xf32>
    %57 = math.exp %56 : vector<8x128xf32>
    %cst_30 = arith.constant 1.000000e+00 : f32
    %58 = vector.broadcast %cst_30 : f32 to vector<8x128xf32>
    %59 = arith.addf %58, %57 : vector<8x128xf32>
    %cst_31 = arith.constant 1.000000e+00 : f32
    %60 = vector.broadcast %cst_31 : f32 to vector<8x128xf32>
    %61 = arith.divf %60, %59 : vector<8x128xf32>
    %62 = vector.extract_strided_slice %53 {offsets = [0, 128], sizes = [8, 128], strides = [1, 1]} : vector<8x512xf32> to vector<8x128xf32>
    %cst_32 = arith.constant 0.000000e+00 : f32
    %63 = vector.broadcast %cst_32 : f32 to vector<8x128xf32>
    %64 = arith.subf %63, %62 : vector<8x128xf32>
    %65 = math.exp %64 : vector<8x128xf32>
    %cst_33 = arith.constant 1.000000e+00 : f32
    %66 = vector.broadcast %cst_33 : f32 to vector<8x128xf32>
    %67 = arith.addf %66, %65 : vector<8x128xf32>
    %cst_34 = arith.constant 1.000000e+00 : f32
    %68 = vector.broadcast %cst_34 : f32 to vector<8x128xf32>
    %69 = arith.divf %68, %67 : vector<8x128xf32>
    %70 = vector.extract_strided_slice %53 {offsets = [0, 256], sizes = [8, 128], strides = [1, 1]} : vector<8x512xf32> to vector<8x128xf32>
    %71 = math.tanh %70 : vector<8x128xf32>
    %72 = vector.extract_strided_slice %53 {offsets = [0, 384], sizes = [8, 128], strides = [1, 1]} : vector<8x512xf32> to vector<8x128xf32>
    %cst_35 = arith.constant 0.000000e+00 : f32
    %73 = vector.broadcast %cst_35 : f32 to vector<8x128xf32>
    %74 = arith.subf %73, %72 : vector<8x128xf32>
    %75 = math.exp %74 : vector<8x128xf32>
    %cst_36 = arith.constant 1.000000e+00 : f32
    %76 = vector.broadcast %cst_36 : f32 to vector<8x128xf32>
    %77 = arith.addf %76, %75 : vector<8x128xf32>
    %cst_37 = arith.constant 1.000000e+00 : f32
    %78 = vector.broadcast %cst_37 : f32 to vector<8x128xf32>
    %79 = arith.divf %78, %77 : vector<8x128xf32>
    %c0_38 = arith.constant 0 : index
    %c0_39 = arith.constant 0 : index
    %80 = vector.load %arg6[%c0_38, %c0_39] : memref<8x128xf32, #tpu.memory_space<vmem>>, vector<8x128xf32>
    %81 = arith.mulf %69, %80 : vector<8x128xf32>
    %82 = arith.mulf %61, %71 : vector<8x128xf32>
    %83 = arith.addf %81, %82 : vector<8x128xf32>
    %84 = math.tanh %83 : vector<8x128xf32>
    %85 = arith.mulf %79, %84 : vector<8x128xf32>
    %c0_40 = arith.constant 0 : index
    %c0_41 = arith.constant 0 : index
    %86 = vector.load %arg6[%c0_40, %c0_41] : memref<8x128xf32, #tpu.memory_space<vmem>>, vector<8x128xf32>
    tpu.vector_store %arg6[%c0_40, %c0_41], %83 {strides = array<i32>} : memref<8x128xf32, #tpu.memory_space<vmem>>, vector<8x128xf32>,
    %c0_42 = arith.constant 0 : index
    %c0_43 = arith.constant 0 : index
    %87 = vector.load %arg5[%c0_42, %c0_43] : memref<8x128xf32, #tpu.memory_space<vmem>>, vector<8x128xf32>
    tpu.vector_store %arg5[%c0_42, %c0_43], %85 {strides = array<i32>} : memref<8x128xf32, #tpu.memory_space<vmem>>, vector<8x128xf32>,
    %88 = arith.index_cast %c1_i32 : i32 to index
    %c0_44 = arith.constant 0 : index
    %c0_45 = arith.constant 0 : index
    %89 = vector.load %arg4[%88, %c0_44, %c0_45] : memref<8x8x128xf32, #tpu.memory_space<vmem>>, vector<1x8x128xf32>
    %90 = vector.shape_cast %89 : vector<1x8x128xf32> to vector<8x128xf32>
    %91 = vector.shape_cast %85 : vector<8x128xf32> to vector<1x8x128xf32>
    tpu.vector_store %arg4[%88, %c0_44, %c0_45], %91 {strides = array<i32>} : memref<8x8x128xf32, #tpu.memory_space<vmem>>, vector<1x8x128xf32>,
    %c2_i32 = arith.constant 2 : i32
    %92 = arith.index_cast %c2_i32 : i32 to index
    %c0_46 = arith.constant 0 : index
    %c0_47 = arith.constant 0 : index
    %93 = vector.load %arg2[%92, %c0_46, %c0_47] : memref<8x8x512xf32, #tpu.memory_space<vmem>>, vector<1x8x512xf32>
    %94 = vector.shape_cast %93 : vector<1x8x512xf32> to vector<8x512xf32>
    %c0_48 = arith.constant 0 : index
    %c0_49 = arith.constant 0 : index
    %95 = vector.load %arg5[%c0_48, %c0_49] : memref<8x128xf32, #tpu.memory_space<vmem>>, vector<8x128xf32>
    %cst_50 = arith.constant dense<0.000000e+00> : vector<8x512xf32>
    %96 = tpu.matmul %95, %3, %cst_50 {dimension_numbers = #tpu.dot_dimension_numbers<[1], [0], [0], [1], [0, 0, 1, 1], [], []>} : vector<8x128xf32>, vector<128x512xf32>, vector<8x512xf32> -> vector<8x512xf32>
    %97 = arith.addf %94, %96 : vector<8x512xf32>
    %98 = vector.extract_strided_slice %97 {offsets = [0, 0], sizes = [8, 128], strides = [1, 1]} : vector<8x512xf32> to vector<8x128xf32>
    %cst_51 = arith.constant 0.000000e+00 : f32
    %99 = vector.broadcast %cst_51 : f32 to vector<8x128xf32>
    %100 = arith.subf %99, %98 : vector<8x128xf32>
    %101 = math.exp %100 : vector<8x128xf32>
    %cst_52 = arith.constant 1.000000e+00 : f32
    %102 = vector.broadcast %cst_52 : f32 to vector<8x128xf32>
    %103 = arith.addf %102, %101 : vector<8x128xf32>
    %cst_53 = arith.constant 1.000000e+00 : f32
    %104 = vector.broadcast %cst_53 : f32 to vector<8x128xf32>
    %105 = arith.divf %104, %103 : vector<8x128xf32>
    %106 = vector.extract_strided_slice %97 {offsets = [0, 128], sizes = [8, 128], strides = [1, 1]} : vector<8x512xf32> to vector<8x128xf32>
    %cst_54 = arith.constant 0.000000e+00 : f32
    %107 = vector.broadcast %cst_54 : f32 to vector<8x128xf32>
    %108 = arith.subf %107, %106 : vector<8x128xf32>
    %109 = math.exp %108 : vector<8x128xf32>
    %cst_55 = arith.constant 1.000000e+00 : f32
    %110 = vector.broadcast %cst_55 : f32 to vector<8x128xf32>
    %111 = arith.addf %110, %109 : vector<8x128xf32>
    %cst_56 = arith.constant 1.000000e+00 : f32
    %112 = vector.broadcast %cst_56 : f32 to vector<8x128xf32>
    %113 = arith.divf %112, %111 : vector<8x128xf32>
    %114 = vector.extract_strided_slice %97 {offsets = [0, 256], sizes = [8, 128], strides = [1, 1]} : vector<8x512xf32> to vector<8x128xf32>
    %115 = math.tanh %114 : vector<8x128xf32>
    %116 = vector.extract_strided_slice %97 {offsets = [0, 384], sizes = [8, 128], strides = [1, 1]} : vector<8x512xf32> to vector<8x128xf32>
    %cst_57 = arith.constant 0.000000e+00 : f32
    %117 = vector.broadcast %cst_57 : f32 to vector<8x128xf32>
    %118 = arith.subf %117, %116 : vector<8x128xf32>
    %119 = math.exp %118 : vector<8x128xf32>
    %cst_58 = arith.constant 1.000000e+00 : f32
    %120 = vector.broadcast %cst_58 : f32 to vector<8x128xf32>
    %121 = arith.addf %120, %119 : vector<8x128xf32>
    %cst_59 = arith.constant 1.000000e+00 : f32
    %122 = vector.broadcast %cst_59 : f32 to vector<8x128xf32>
    %123 = arith.divf %122, %121 : vector<8x128xf32>
    %c0_60 = arith.constant 0 : index
    %c0_61 = arith.constant 0 : index
    %124 = vector.load %arg6[%c0_60, %c0_61] : memref<8x128xf32, #tpu.memory_space<vmem>>, vector<8x128xf32>
    %125 = arith.mulf %113, %124 : vector<8x128xf32>
    %126 = arith.mulf %105, %115 : vector<8x128xf32>
    %127 = arith.addf %125, %126 : vector<8x128xf32>
    %128 = math.tanh %127 : vector<8x128xf32>
    %129 = arith.mulf %123, %128 : vector<8x128xf32>
    %c0_62 = arith.constant 0 : index
    %c0_63 = arith.constant 0 : index
    %130 = vector.load %arg6[%c0_62, %c0_63] : memref<8x128xf32, #tpu.memory_space<vmem>>, vector<8x128xf32>
    tpu.vector_store %arg6[%c0_62, %c0_63], %127 {strides = array<i32>} : memref<8x128xf32, #tpu.memory_space<vmem>>, vector<8x128xf32>,
    %c0_64 = arith.constant 0 : index
    %c0_65 = arith.constant 0 : index
    %131 = vector.load %arg5[%c0_64, %c0_65] : memref<8x128xf32, #tpu.memory_space<vmem>>, vector<8x128xf32>
    tpu.vector_store %arg5[%c0_64, %c0_65], %129 {strides = array<i32>} : memref<8x128xf32, #tpu.memory_space<vmem>>, vector<8x128xf32>,
    %132 = arith.index_cast %c2_i32 : i32 to index
    %c0_66 = arith.constant 0 : index
    %c0_67 = arith.constant 0 : index
    %133 = vector.load %arg4[%132, %c0_66, %c0_67] : memref<8x8x128xf32, #tpu.memory_space<vmem>>, vector<1x8x128xf32>
    %134 = vector.shape_cast %133 : vector<1x8x128xf32> to vector<8x128xf32>
    %135 = vector.shape_cast %129 : vector<8x128xf32> to vector<1x8x128xf32>
    tpu.vector_store %arg4[%132, %c0_66, %c0_67], %135 {strides = array<i32>} : memref<8x8x128xf32, #tpu.memory_space<vmem>>, vector<1x8x128xf32>,
    %c3_i32 = arith.constant 3 : i32
    %136 = arith.index_cast %c3_i32 : i32 to index
    %c0_68 = arith.constant 0 : index
    %c0_69 = arith.constant 0 : index
    %137 = vector.load %arg2[%136, %c0_68, %c0_69] : memref<8x8x512xf32, #tpu.memory_space<vmem>>, vector<1x8x512xf32>
    %138 = vector.shape_cast %137 : vector<1x8x512xf32> to vector<8x512xf32>
    %c0_70 = arith.constant 0 : index
    %c0_71 = arith.constant 0 : index
    %139 = vector.load %arg5[%c0_70, %c0_71] : memref<8x128xf32, #tpu.memory_space<vmem>>, vector<8x128xf32>
    %cst_72 = arith.constant dense<0.000000e+00> : vector<8x512xf32>
    %140 = tpu.matmul %139, %3, %cst_72 {dimension_numbers = #tpu.dot_dimension_numbers<[1], [0], [0], [1], [0, 0, 1, 1], [], []>} : vector<8x128xf32>, vector<128x512xf32>, vector<8x512xf32> -> vector<8x512xf32>
    %141 = arith.addf %138, %140 : vector<8x512xf32>
    %142 = vector.extract_strided_slice %141 {offsets = [0, 0], sizes = [8, 128], strides = [1, 1]} : vector<8x512xf32> to vector<8x128xf32>
    %cst_73 = arith.constant 0.000000e+00 : f32
    %143 = vector.broadcast %cst_73 : f32 to vector<8x128xf32>
    %144 = arith.subf %143, %142 : vector<8x128xf32>
    %145 = math.exp %144 : vector<8x128xf32>
    %cst_74 = arith.constant 1.000000e+00 : f32
    %146 = vector.broadcast %cst_74 : f32 to vector<8x128xf32>
    %147 = arith.addf %146, %145 : vector<8x128xf32>
    %cst_75 = arith.constant 1.000000e+00 : f32
    %148 = vector.broadcast %cst_75 : f32 to vector<8x128xf32>
    %149 = arith.divf %148, %147 : vector<8x128xf32>
    %150 = vector.extract_strided_slice %141 {offsets = [0, 128], sizes = [8, 128], strides = [1, 1]} : vector<8x512xf32> to vector<8x128xf32>
    %cst_76 = arith.constant 0.000000e+00 : f32
    %151 = vector.broadcast %cst_76 : f32 to vector<8x128xf32>
    %152 = arith.subf %151, %150 : vector<8x128xf32>
    %153 = math.exp %152 : vector<8x128xf32>
    %cst_77 = arith.constant 1.000000e+00 : f32
    %154 = vector.broadcast %cst_77 : f32 to vector<8x128xf32>
    %155 = arith.addf %154, %153 : vector<8x128xf32>
    %cst_78 = arith.constant 1.000000e+00 : f32
    %156 = vector.broadcast %cst_78 : f32 to vector<8x128xf32>
    %157 = arith.divf %156, %155 : vector<8x128xf32>
    %158 = vector.extract_strided_slice %141 {offsets = [0, 256], sizes = [8, 128], strides = [1, 1]} : vector<8x512xf32> to vector<8x128xf32>
    %159 = math.tanh %158 : vector<8x128xf32>
    %160 = vector.extract_strided_slice %141 {offsets = [0, 384], sizes = [8, 128], strides = [1, 1]} : vector<8x512xf32> to vector<8x128xf32>
    %cst_79 = arith.constant 0.000000e+00 : f32
    %161 = vector.broadcast %cst_79 : f32 to vector<8x128xf32>
    %162 = arith.subf %161, %160 : vector<8x128xf32>
    %163 = math.exp %162 : vector<8x128xf32>
    %cst_80 = arith.constant 1.000000e+00 : f32
    %164 = vector.broadcast %cst_80 : f32 to vector<8x128xf32>
    %165 = arith.addf %164, %163 : vector<8x128xf32>
    %cst_81 = arith.constant 1.000000e+00 : f32
    %166 = vector.broadcast %cst_81 : f32 to vector<8x128xf32>
    %167 = arith.divf %166, %165 : vector<8x128xf32>
    %c0_82 = arith.constant 0 : index
    %c0_83 = arith.constant 0 : index
    %168 = vector.load %arg6[%c0_82, %c0_83] : memref<8x128xf32, #tpu.memory_space<vmem>>, vector<8x128xf32>
    %169 = arith.mulf %157, %168 : vector<8x128xf32>
    %170 = arith.mulf %149, %159 : vector<8x128xf32>
    %171 = arith.addf %169, %170 : vector<8x128xf32>
    %172 = math.tanh %171 : vector<8x128xf32>
    %173 = arith.mulf %167, %172 : vector<8x128xf32>
    %c0_84 = arith.constant 0 : index
    %c0_85 = arith.constant 0 : index
    %174 = vector.load %arg6[%c0_84, %c0_85] : memref<8x128xf32, #tpu.memory_space<vmem>>, vector<8x128xf32>
    tpu.vector_store %arg6[%c0_84, %c0_85], %171 {strides = array<i32>} : memref<8x128xf32, #tpu.memory_space<vmem>>, vector<8x128xf32>,
    %c0_86 = arith.constant 0 : index
    %c0_87 = arith.constant 0 : index
    %175 = vector.load %arg5[%c0_86, %c0_87] : memref<8x128xf32, #tpu.memory_space<vmem>>, vector<8x128xf32>
    tpu.vector_store %arg5[%c0_86, %c0_87], %173 {strides = array<i32>} : memref<8x128xf32, #tpu.memory_space<vmem>>, vector<8x128xf32>,
    %176 = arith.index_cast %c3_i32 : i32 to index
    %c0_88 = arith.constant 0 : index
    %c0_89 = arith.constant 0 : index
    %177 = vector.load %arg4[%176, %c0_88, %c0_89] : memref<8x8x128xf32, #tpu.memory_space<vmem>>, vector<1x8x128xf32>
    %178 = vector.shape_cast %177 : vector<1x8x128xf32> to vector<8x128xf32>
    %179 = vector.shape_cast %173 : vector<8x128xf32> to vector<1x8x128xf32>
    tpu.vector_store %arg4[%176, %c0_88, %c0_89], %179 {strides = array<i32>} : memref<8x8x128xf32, #tpu.memory_space<vmem>>, vector<1x8x128xf32>,
    %c4_i32 = arith.constant 4 : i32
    %180 = arith.index_cast %c4_i32 : i32 to index
    %c0_90 = arith.constant 0 : index
    %c0_91 = arith.constant 0 : index
    %181 = vector.load %arg2[%180, %c0_90, %c0_91] : memref<8x8x512xf32, #tpu.memory_space<vmem>>, vector<1x8x512xf32>
    %182 = vector.shape_cast %181 : vector<1x8x512xf32> to vector<8x512xf32>
    %c0_92 = arith.constant 0 : index
    %c0_93 = arith.constant 0 : index
    %183 = vector.load %arg5[%c0_92, %c0_93] : memref<8x128xf32, #tpu.memory_space<vmem>>, vector<8x128xf32>
    %cst_94 = arith.constant dense<0.000000e+00> : vector<8x512xf32>
    %184 = tpu.matmul %183, %3, %cst_94 {dimension_numbers = #tpu.dot_dimension_numbers<[1], [0], [0], [1], [0, 0, 1, 1], [], []>} : vector<8x128xf32>, vector<128x512xf32>, vector<8x512xf32> -> vector<8x512xf32>
    %185 = arith.addf %182, %184 : vector<8x512xf32>
    %186 = vector.extract_strided_slice %185 {offsets = [0, 0], sizes = [8, 128], strides = [1, 1]} : vector<8x512xf32> to vector<8x128xf32>
    %cst_95 = arith.constant 0.000000e+00 : f32
    %187 = vector.broadcast %cst_95 : f32 to vector<8x128xf32>
    %188 = arith.subf %187, %186 : vector<8x128xf32>
    %189 = math.exp %188 : vector<8x128xf32>
    %cst_96 = arith.constant 1.000000e+00 : f32
    %190 = vector.broadcast %cst_96 : f32 to vector<8x128xf32>
    %191 = arith.addf %190, %189 : vector<8x128xf32>
    %cst_97 = arith.constant 1.000000e+00 : f32
    %192 = vector.broadcast %cst_97 : f32 to vector<8x128xf32>
    %193 = arith.divf %192, %191 : vector<8x128xf32>
    %194 = vector.extract_strided_slice %185 {offsets = [0, 128], sizes = [8, 128], strides = [1, 1]} : vector<8x512xf32> to vector<8x128xf32>
    %cst_98 = arith.constant 0.000000e+00 : f32
    %195 = vector.broadcast %cst_98 : f32 to vector<8x128xf32>
    %196 = arith.subf %195, %194 : vector<8x128xf32>
    %197 = math.exp %196 : vector<8x128xf32>
    %cst_99 = arith.constant 1.000000e+00 : f32
    %198 = vector.broadcast %cst_99 : f32 to vector<8x128xf32>
    %199 = arith.addf %198, %197 : vector<8x128xf32>
    %cst_100 = arith.constant 1.000000e+00 : f32
    %200 = vector.broadcast %cst_100 : f32 to vector<8x128xf32>
    %201 = arith.divf %200, %199 : vector<8x128xf32>
    %202 = vector.extract_strided_slice %185 {offsets = [0, 256], sizes = [8, 128], strides = [1, 1]} : vector<8x512xf32> to vector<8x128xf32>
    %203 = math.tanh %202 : vector<8x128xf32>
    %204 = vector.extract_strided_slice %185 {offsets = [0, 384], sizes = [8, 128], strides = [1, 1]} : vector<8x512xf32> to vector<8x128xf32>
    %cst_101 = arith.constant 0.000000e+00 : f32
    %205 = vector.broadcast %cst_101 : f32 to vector<8x128xf32>
    %206 = arith.subf %205, %204 : vector<8x128xf32>
    %207 = math.exp %206 : vector<8x128xf32>
    %cst_102 = arith.constant 1.000000e+00 : f32
    %208 = vector.broadcast %cst_102 : f32 to vector<8x128xf32>
    %209 = arith.addf %208, %207 : vector<8x128xf32>
    %cst_103 = arith.constant 1.000000e+00 : f32
    %210 = vector.broadcast %cst_103 : f32 to vector<8x128xf32>
    %211 = arith.divf %210, %209 : vector<8x128xf32>
    %c0_104 = arith.constant 0 : index
    %c0_105 = arith.constant 0 : index
    %212 = vector.load %arg6[%c0_104, %c0_105] : memref<8x128xf32, #tpu.memory_space<vmem>>, vector<8x128xf32>
    %213 = arith.mulf %201, %212 : vector<8x128xf32>
    %214 = arith.mulf %193, %203 : vector<8x128xf32>
    %215 = arith.addf %213, %214 : vector<8x128xf32>
    %216 = math.tanh %215 : vector<8x128xf32>
    %217 = arith.mulf %211, %216 : vector<8x128xf32>
    %c0_106 = arith.constant 0 : index
    %c0_107 = arith.constant 0 : index
    %218 = vector.load %arg6[%c0_106, %c0_107] : memref<8x128xf32, #tpu.memory_space<vmem>>, vector<8x128xf32>
    tpu.vector_store %arg6[%c0_106, %c0_107], %215 {strides = array<i32>} : memref<8x128xf32, #tpu.memory_space<vmem>>, vector<8x128xf32>,
    %c0_108 = arith.constant 0 : index
    %c0_109 = arith.constant 0 : index
    %219 = vector.load %arg5[%c0_108, %c0_109] : memref<8x128xf32, #tpu.memory_space<vmem>>, vector<8x128xf32>
    tpu.vector_store %arg5[%c0_108, %c0_109], %217 {strides = array<i32>} : memref<8x128xf32, #tpu.memory_space<vmem>>, vector<8x128xf32>,
    %220 = arith.index_cast %c4_i32 : i32 to index
    %c0_110 = arith.constant 0 : index
    %c0_111 = arith.constant 0 : index
    %221 = vector.load %arg4[%220, %c0_110, %c0_111] : memref<8x8x128xf32, #tpu.memory_space<vmem>>, vector<1x8x128xf32>
    %222 = vector.shape_cast %221 : vector<1x8x128xf32> to vector<8x128xf32>
    %223 = vector.shape_cast %217 : vector<8x128xf32> to vector<1x8x128xf32>
    tpu.vector_store %arg4[%220, %c0_110, %c0_111], %223 {strides = array<i32>} : memref<8x8x128xf32, #tpu.memory_space<vmem>>, vector<1x8x128xf32>,
    %c5_i32 = arith.constant 5 : i32
    %224 = arith.index_cast %c5_i32 : i32 to index
    %c0_112 = arith.constant 0 : index
    %c0_113 = arith.constant 0 : index
    %225 = vector.load %arg2[%224, %c0_112, %c0_113] : memref<8x8x512xf32, #tpu.memory_space<vmem>>, vector<1x8x512xf32>
    %226 = vector.shape_cast %225 : vector<1x8x512xf32> to vector<8x512xf32>
    %c0_114 = arith.constant 0 : index
    %c0_115 = arith.constant 0 : index
    %227 = vector.load %arg5[%c0_114, %c0_115] : memref<8x128xf32, #tpu.memory_space<vmem>>, vector<8x128xf32>
    %cst_116 = arith.constant dense<0.000000e+00> : vector<8x512xf32>
    %228 = tpu.matmul %227, %3, %cst_116 {dimension_numbers = #tpu.dot_dimension_numbers<[1], [0], [0], [1], [0, 0, 1, 1], [], []>} : vector<8x128xf32>, vector<128x512xf32>, vector<8x512xf32> -> vector<8x512xf32>
    %229 = arith.addf %226, %228 : vector<8x512xf32>
    %230 = vector.extract_strided_slice %229 {offsets = [0, 0], sizes = [8, 128], strides = [1, 1]} : vector<8x512xf32> to vector<8x128xf32>
    %cst_117 = arith.constant 0.000000e+00 : f32
    %231 = vector.broadcast %cst_117 : f32 to vector<8x128xf32>
    %232 = arith.subf %231, %230 : vector<8x128xf32>
    %233 = math.exp %232 : vector<8x128xf32>
    %cst_118 = arith.constant 1.000000e+00 : f32
    %234 = vector.broadcast %cst_118 : f32 to vector<8x128xf32>
    %235 = arith.addf %234, %233 : vector<8x128xf32>
    %cst_119 = arith.constant 1.000000e+00 : f32
    %236 = vector.broadcast %cst_119 : f32 to vector<8x128xf32>
    %237 = arith.divf %236, %235 : vector<8x128xf32>
    %238 = vector.extract_strided_slice %229 {offsets = [0, 128], sizes = [8, 128], strides = [1, 1]} : vector<8x512xf32> to vector<8x128xf32>
    %cst_120 = arith.constant 0.000000e+00 : f32
    %239 = vector.broadcast %cst_120 : f32 to vector<8x128xf32>
    %240 = arith.subf %239, %238 : vector<8x128xf32>
    %241 = math.exp %240 : vector<8x128xf32>
    %cst_121 = arith.constant 1.000000e+00 : f32
    %242 = vector.broadcast %cst_121 : f32 to vector<8x128xf32>
    %243 = arith.addf %242, %241 : vector<8x128xf32>
    %cst_122 = arith.constant 1.000000e+00 : f32
    %244 = vector.broadcast %cst_122 : f32 to vector<8x128xf32>
    %245 = arith.divf %244, %243 : vector<8x128xf32>
    %246 = vector.extract_strided_slice %229 {offsets = [0, 256], sizes = [8, 128], strides = [1, 1]} : vector<8x512xf32> to vector<8x128xf32>
    %247 = math.tanh %246 : vector<8x128xf32>
    %248 = vector.extract_strided_slice %229 {offsets = [0, 384], sizes = [8, 128], strides = [1, 1]} : vector<8x512xf32> to vector<8x128xf32>
    %cst_123 = arith.constant 0.000000e+00 : f32
    %249 = vector.broadcast %cst_123 : f32 to vector<8x128xf32>
    %250 = arith.subf %249, %248 : vector<8x128xf32>
    %251 = math.exp %250 : vector<8x128xf32>
    %cst_124 = arith.constant 1.000000e+00 : f32
    %252 = vector.broadcast %cst_124 : f32 to vector<8x128xf32>
    %253 = arith.addf %252, %251 : vector<8x128xf32>
    %cst_125 = arith.constant 1.000000e+00 : f32
    %254 = vector.broadcast %cst_125 : f32 to vector<8x128xf32>
    %255 = arith.divf %254, %253 : vector<8x128xf32>
    %c0_126 = arith.constant 0 : index
    %c0_127 = arith.constant 0 : index
    %256 = vector.load %arg6[%c0_126, %c0_127] : memref<8x128xf32, #tpu.memory_space<vmem>>, vector<8x128xf32>
    %257 = arith.mulf %245, %256 : vector<8x128xf32>
    %258 = arith.mulf %237, %247 : vector<8x128xf32>
    %259 = arith.addf %257, %258 : vector<8x128xf32>
    %260 = math.tanh %259 : vector<8x128xf32>
    %261 = arith.mulf %255, %260 : vector<8x128xf32>
    %c0_128 = arith.constant 0 : index
    %c0_129 = arith.constant 0 : index
    %262 = vector.load %arg6[%c0_128, %c0_129] : memref<8x128xf32, #tpu.memory_space<vmem>>, vector<8x128xf32>
    tpu.vector_store %arg6[%c0_128, %c0_129], %259 {strides = array<i32>} : memref<8x128xf32, #tpu.memory_space<vmem>>, vector<8x128xf32>,
    %c0_130 = arith.constant 0 : index
    %c0_131 = arith.constant 0 : index
    %263 = vector.load %arg5[%c0_130, %c0_131] : memref<8x128xf32, #tpu.memory_space<vmem>>, vector<8x128xf32>
    tpu.vector_store %arg5[%c0_130, %c0_131], %261 {strides = array<i32>} : memref<8x128xf32, #tpu.memory_space<vmem>>, vector<8x128xf32>,
    %264 = arith.index_cast %c5_i32 : i32 to index
    %c0_132 = arith.constant 0 : index
    %c0_133 = arith.constant 0 : index
    %265 = vector.load %arg4[%264, %c0_132, %c0_133] : memref<8x8x128xf32, #tpu.memory_space<vmem>>, vector<1x8x128xf32>
    %266 = vector.shape_cast %265 : vector<1x8x128xf32> to vector<8x128xf32>
    %267 = vector.shape_cast %261 : vector<8x128xf32> to vector<1x8x128xf32>
    tpu.vector_store %arg4[%264, %c0_132, %c0_133], %267 {strides = array<i32>} : memref<8x8x128xf32, #tpu.memory_space<vmem>>, vector<1x8x128xf32>,
    %c6_i32 = arith.constant 6 : i32
    %268 = arith.index_cast %c6_i32 : i32 to index
    %c0_134 = arith.constant 0 : index
    %c0_135 = arith.constant 0 : index
    %269 = vector.load %arg2[%268, %c0_134, %c0_135] : memref<8x8x512xf32, #tpu.memory_space<vmem>>, vector<1x8x512xf32>
    %270 = vector.shape_cast %269 : vector<1x8x512xf32> to vector<8x512xf32>
    %c0_136 = arith.constant 0 : index
    %c0_137 = arith.constant 0 : index
    %271 = vector.load %arg5[%c0_136, %c0_137] : memref<8x128xf32, #tpu.memory_space<vmem>>, vector<8x128xf32>
    %cst_138 = arith.constant dense<0.000000e+00> : vector<8x512xf32>
    %272 = tpu.matmul %271, %3, %cst_138 {dimension_numbers = #tpu.dot_dimension_numbers<[1], [0], [0], [1], [0, 0, 1, 1], [], []>} : vector<8x128xf32>, vector<128x512xf32>, vector<8x512xf32> -> vector<8x512xf32>
    %273 = arith.addf %270, %272 : vector<8x512xf32>
    %274 = vector.extract_strided_slice %273 {offsets = [0, 0], sizes = [8, 128], strides = [1, 1]} : vector<8x512xf32> to vector<8x128xf32>
    %cst_139 = arith.constant 0.000000e+00 : f32
    %275 = vector.broadcast %cst_139 : f32 to vector<8x128xf32>
    %276 = arith.subf %275, %274 : vector<8x128xf32>
    %277 = math.exp %276 : vector<8x128xf32>
    %cst_140 = arith.constant 1.000000e+00 : f32
    %278 = vector.broadcast %cst_140 : f32 to vector<8x128xf32>
    %279 = arith.addf %278, %277 : vector<8x128xf32>
    %cst_141 = arith.constant 1.000000e+00 : f32
    %280 = vector.broadcast %cst_141 : f32 to vector<8x128xf32>
    %281 = arith.divf %280, %279 : vector<8x128xf32>
    %282 = vector.extract_strided_slice %273 {offsets = [0, 128], sizes = [8, 128], strides = [1, 1]} : vector<8x512xf32> to vector<8x128xf32>
    %cst_142 = arith.constant 0.000000e+00 : f32
    %283 = vector.broadcast %cst_142 : f32 to vector<8x128xf32>
    %284 = arith.subf %283, %282 : vector<8x128xf32>
    %285 = math.exp %284 : vector<8x128xf32>
    %cst_143 = arith.constant 1.000000e+00 : f32
    %286 = vector.broadcast %cst_143 : f32 to vector<8x128xf32>
    %287 = arith.addf %286, %285 : vector<8x128xf32>
    %cst_144 = arith.constant 1.000000e+00 : f32
    %288 = vector.broadcast %cst_144 : f32 to vector<8x128xf32>
    %289 = arith.divf %288, %287 : vector<8x128xf32>
    %290 = vector.extract_strided_slice %273 {offsets = [0, 256], sizes = [8, 128], strides = [1, 1]} : vector<8x512xf32> to vector<8x128xf32>
    %291 = math.tanh %290 : vector<8x128xf32>
    %292 = vector.extract_strided_slice %273 {offsets = [0, 384], sizes = [8, 128], strides = [1, 1]} : vector<8x512xf32> to vector<8x128xf32>
    %cst_145 = arith.constant 0.000000e+00 : f32
    %293 = vector.broadcast %cst_145 : f32 to vector<8x128xf32>
    %294 = arith.subf %293, %292 : vector<8x128xf32>
    %295 = math.exp %294 : vector<8x128xf32>
    %cst_146 = arith.constant 1.000000e+00 : f32
    %296 = vector.broadcast %cst_146 : f32 to vector<8x128xf32>
    %297 = arith.addf %296, %295 : vector<8x128xf32>
    %cst_147 = arith.constant 1.000000e+00 : f32
    %298 = vector.broadcast %cst_147 : f32 to vector<8x128xf32>
    %299 = arith.divf %298, %297 : vector<8x128xf32>
    %c0_148 = arith.constant 0 : index
    %c0_149 = arith.constant 0 : index
    %300 = vector.load %arg6[%c0_148, %c0_149] : memref<8x128xf32, #tpu.memory_space<vmem>>, vector<8x128xf32>
    %301 = arith.mulf %289, %300 : vector<8x128xf32>
    %302 = arith.mulf %281, %291 : vector<8x128xf32>
    %303 = arith.addf %301, %302 : vector<8x128xf32>
    %304 = math.tanh %303 : vector<8x128xf32>
    %305 = arith.mulf %299, %304 : vector<8x128xf32>
    %c0_150 = arith.constant 0 : index
    %c0_151 = arith.constant 0 : index
    %306 = vector.load %arg6[%c0_150, %c0_151] : memref<8x128xf32, #tpu.memory_space<vmem>>, vector<8x128xf32>
    tpu.vector_store %arg6[%c0_150, %c0_151], %303 {strides = array<i32>} : memref<8x128xf32, #tpu.memory_space<vmem>>, vector<8x128xf32>,
    %c0_152 = arith.constant 0 : index
    %c0_153 = arith.constant 0 : index
    %307 = vector.load %arg5[%c0_152, %c0_153] : memref<8x128xf32, #tpu.memory_space<vmem>>, vector<8x128xf32>
    tpu.vector_store %arg5[%c0_152, %c0_153], %305 {strides = array<i32>} : memref<8x128xf32, #tpu.memory_space<vmem>>, vector<8x128xf32>,
    %308 = arith.index_cast %c6_i32 : i32 to index
    %c0_154 = arith.constant 0 : index
    %c0_155 = arith.constant 0 : index
    %309 = vector.load %arg4[%308, %c0_154, %c0_155] : memref<8x8x128xf32, #tpu.memory_space<vmem>>, vector<1x8x128xf32>
    %310 = vector.shape_cast %309 : vector<1x8x128xf32> to vector<8x128xf32>
    %311 = vector.shape_cast %305 : vector<8x128xf32> to vector<1x8x128xf32>
    tpu.vector_store %arg4[%308, %c0_154, %c0_155], %311 {strides = array<i32>} : memref<8x8x128xf32, #tpu.memory_space<vmem>>, vector<1x8x128xf32>,
    %c7_i32 = arith.constant 7 : i32
    %312 = arith.index_cast %c7_i32 : i32 to index
    %c0_156 = arith.constant 0 : index
    %c0_157 = arith.constant 0 : index
    %313 = vector.load %arg2[%312, %c0_156, %c0_157] : memref<8x8x512xf32, #tpu.memory_space<vmem>>, vector<1x8x512xf32>
    %314 = vector.shape_cast %313 : vector<1x8x512xf32> to vector<8x512xf32>
    %c0_158 = arith.constant 0 : index
    %c0_159 = arith.constant 0 : index
    %315 = vector.load %arg5[%c0_158, %c0_159] : memref<8x128xf32, #tpu.memory_space<vmem>>, vector<8x128xf32>
    %cst_160 = arith.constant dense<0.000000e+00> : vector<8x512xf32>
    %316 = tpu.matmul %315, %3, %cst_160 {dimension_numbers = #tpu.dot_dimension_numbers<[1], [0], [0], [1], [0, 0, 1, 1], [], []>} : vector<8x128xf32>, vector<128x512xf32>, vector<8x512xf32> -> vector<8x512xf32>
    %317 = arith.addf %314, %316 : vector<8x512xf32>
    %318 = vector.extract_strided_slice %317 {offsets = [0, 0], sizes = [8, 128], strides = [1, 1]} : vector<8x512xf32> to vector<8x128xf32>
    %cst_161 = arith.constant 0.000000e+00 : f32
    %319 = vector.broadcast %cst_161 : f32 to vector<8x128xf32>
    %320 = arith.subf %319, %318 : vector<8x128xf32>
    %321 = math.exp %320 : vector<8x128xf32>
    %cst_162 = arith.constant 1.000000e+00 : f32
    %322 = vector.broadcast %cst_162 : f32 to vector<8x128xf32>
    %323 = arith.addf %322, %321 : vector<8x128xf32>
    %cst_163 = arith.constant 1.000000e+00 : f32
    %324 = vector.broadcast %cst_163 : f32 to vector<8x128xf32>
    %325 = arith.divf %324, %323 : vector<8x128xf32>
    %326 = vector.extract_strided_slice %317 {offsets = [0, 128], sizes = [8, 128], strides = [1, 1]} : vector<8x512xf32> to vector<8x128xf32>
    %cst_164 = arith.constant 0.000000e+00 : f32
    %327 = vector.broadcast %cst_164 : f32 to vector<8x128xf32>
    %328 = arith.subf %327, %326 : vector<8x128xf32>
    %329 = math.exp %328 : vector<8x128xf32>
    %cst_165 = arith.constant 1.000000e+00 : f32
    %330 = vector.broadcast %cst_165 : f32 to vector<8x128xf32>
    %331 = arith.addf %330, %329 : vector<8x128xf32>
    %cst_166 = arith.constant 1.000000e+00 : f32
    %332 = vector.broadcast %cst_166 : f32 to vector<8x128xf32>
    %333 = arith.divf %332, %331 : vector<8x128xf32>
    %334 = vector.extract_strided_slice %317 {offsets = [0, 256], sizes = [8, 128], strides = [1, 1]} : vector<8x512xf32> to vector<8x128xf32>
    %335 = math.tanh %334 : vector<8x128xf32>
    %336 = vector.extract_strided_slice %317 {offsets = [0, 384], sizes = [8, 128], strides = [1, 1]} : vector<8x512xf32> to vector<8x128xf32>
    %cst_167 = arith.constant 0.000000e+00 : f32
    %337 = vector.broadcast %cst_167 : f32 to vector<8x128xf32>
    %338 = arith.subf %337, %336 : vector<8x128xf32>
    %339 = math.exp %338 : vector<8x128xf32>
    %cst_168 = arith.constant 1.000000e+00 : f32
    %340 = vector.broadcast %cst_168 : f32 to vector<8x128xf32>
    %341 = arith.addf %340, %339 : vector<8x128xf32>
    %cst_169 = arith.constant 1.000000e+00 : f32
    %342 = vector.broadcast %cst_169 : f32 to vector<8x128xf32>
    %343 = arith.divf %342, %341 : vector<8x128xf32>
    %c0_170 = arith.constant 0 : index
    %c0_171 = arith.constant 0 : index
    %344 = vector.load %arg6[%c0_170, %c0_171] : memref<8x128xf32, #tpu.memory_space<vmem>>, vector<8x128xf32>
    %345 = arith.mulf %333, %344 : vector<8x128xf32>
    %346 = arith.mulf %325, %335 : vector<8x128xf32>
    %347 = arith.addf %345, %346 : vector<8x128xf32>
    %348 = math.tanh %347 : vector<8x128xf32>
    %349 = arith.mulf %343, %348 : vector<8x128xf32>
    %c0_172 = arith.constant 0 : index
    %c0_173 = arith.constant 0 : index
    %350 = vector.load %arg6[%c0_172, %c0_173] : memref<8x128xf32, #tpu.memory_space<vmem>>, vector<8x128xf32>
    tpu.vector_store %arg6[%c0_172, %c0_173], %347 {strides = array<i32>} : memref<8x128xf32, #tpu.memory_space<vmem>>, vector<8x128xf32>,
    %c0_174 = arith.constant 0 : index
    %c0_175 = arith.constant 0 : index
    %351 = vector.load %arg5[%c0_174, %c0_175] : memref<8x128xf32, #tpu.memory_space<vmem>>, vector<8x128xf32>
    tpu.vector_store %arg5[%c0_174, %c0_175], %349 {strides = array<i32>} : memref<8x128xf32, #tpu.memory_space<vmem>>, vector<8x128xf32>,
    %352 = arith.index_cast %c7_i32 : i32 to index
    %c0_176 = arith.constant 0 : index
    %c0_177 = arith.constant 0 : index
    %353 = vector.load %arg4[%352, %c0_176, %c0_177] : memref<8x8x128xf32, #tpu.memory_space<vmem>>, vector<1x8x128xf32>
    %354 = vector.shape_cast %353 : vector<1x8x128xf32> to vector<8x128xf32>
    %355 = vector.shape_cast %349 : vector<8x128xf32> to vector<1x8x128xf32>
    tpu.vector_store %arg4[%352, %c0_176, %c0_177], %355 {strides = array<i32>} : memref<8x8x128xf32, #tpu.memory_space<vmem>>, vector<1x8x128xf32>,
    %c8_i32 = arith.constant 8 : i32
    return
  }
  func.func @transform_0(%arg0: i32, %arg1: i32) -> (i32, i32, i32) {
    %c0_i32 = arith.constant 0 : i32
    %c0_i32_0 = arith.constant 0 : i32
    return %arg1, %arg0, %c0_i32 : i32, i32, i32
  }
  func.func @transform_1(%arg0: i32, %arg1: i32) -> (i32, i32) {
    %c0_i32 = arith.constant 0 : i32
    %c0_i32_0 = arith.constant 0 : i32
    %c0_i32_1 = arith.constant 0 : i32
    return %c0_i32, %c0_i32_0 : i32, i32
  }
  func.func @transform_2(%arg0: i32, %arg1: i32) -> (i32, i32, i32) {
    %c0_i32 = arith.constant 0 : i32
    %c0_i32_0 = arith.constant 0 : i32
    return %arg1, %arg0, %c0_i32 : i32, i32, i32
  }
}

</mosaic_0001>

<bundles_post_ra>
// kernel: deep_recommender_forward.5
= control target key start
LH: loop header
LB: loop body
LE: loop exit
PB: predicated region body
PF: predicated region fallthrough
CT: control target
= control target key end

     0   :  { %v178_v3 = vmov 0.0   ;;  %v50_v35 = vlaneseq  ;;  %s316_s1 = inlined_call_operand.vmem [shape: f32[128,256], index: 1, kind: input, shape index: {}]   ;;  %s317_s0 = inlined_call_operand.vmem [shape: f32[16,128], index: 0, kind: input, shape index: {}]   ;;  %s318_s2 = inlined_call_operand.vmem [shape: f32[1,256], index: 2, kind: input, shape index: {}]   ;;  %s319_s3 = inlined_call_operand.vmem [shape: f32[16,256], index: 3, kind: output, shape index: {}]  }
   0x1   :  { %v47_v0 = vld [vmem:[%s316_s1 + $0xf8] sm:$0xff]  ;;  %v46_v1 = vld [vmem:[%s316_s1 + $0xf0] sm:$0xff]  ;;  %v45_v2 = vld [vmem:[%s316_s1 + $0xe8] sm:$0xff]  ;;  %124 = vmatprep.mubr.f32.mxu0 %v178_v3  ;;  %130 = vmatprep.mubr.f32.mxu1 %v178_v3 }
   0x2   :  { %60 = vmatprep.subr.mxu0 %v47_v0  ;;  %145 = vmatprep.subr.mxu1 %v47_v0  ;;  %v44_v4 = vld [vmem:[%s316_s1 + $0xe0] sm:$0xff]  ;;  %v43_v5 = vld [vmem:[%s316_s1 + $0xd8] sm:$0xff]  ;;  %v42_v6 = vld [vmem:[%s316_s1 + $0xd0] sm:$0xff]  ;;  %v51_v36 = vshrl.u32 %v50_v35, 7 }
   0x3   :  { %61 = vmatpush1.msra.mxu0 %v46_v1  ;;  %161 = vmatpush1.msra.mxu1 %v46_v1  ;;  %v41_v7 = vld [vmem:[%s316_s1 + $0xc8] sm:$0xff]  ;;  %v40_v8 = vld [vmem:[%s316_s1 + $0xc0] sm:$0xff]  ;;  %v39_v9 = vld [vmem:[%s316_s1 + $0xb8] sm:$0xff] }
   0x4   :  { %62 = vmatprep.subr.mxu0 %v45_v2  ;;  %146 = vmatprep.subr.mxu1 %v45_v2  ;;  %v38_v10 = vld [vmem:[%s316_s1 + $0xb0] sm:$0xff]  ;;  %v37_v11 = vld [vmem:[%s316_s1 + $0xa8] sm:$0xff]  ;;  %v36_v12 = vld [vmem:[%s316_s1 + $0xa0] sm:$0xff]  ;;  %v52_v37 = vsub.s32 0, %v51_v36  ;;  %v56_v39 = vsub.s32 1, %v51_v36 }
   0x5   :  { %63 = vmatpush1.msra.mxu0 %v44_v4  ;;  %162 = vmatpush1.msra.mxu1 %v44_v4  ;;  %v35_v13 = vld [vmem:[%s316_s1 + $0x98] sm:$0xff]  ;;  %v34_v14 = vld [vmem:[%s316_s1 + $0x90] sm:$0xff]  ;;  %v33_v15 = vld [vmem:[%s316_s1 + $0x88] sm:$0xff] }
   0x6   :  { %64 = vmatprep.subr.mxu0 %v43_v5  ;;  %147 = vmatprep.subr.mxu1 %v43_v5  ;;  %v32_v16 = vld [vmem:[%s316_s1 + $0x80] sm:$0xff]  ;;  %v31_v17 = vld [vmem:[%s316_s1 + $0x78] sm:$0xff]  ;;  %v30_v18 = vld [vmem:[%s316_s1 + $0x70] sm:$0xff] }
   0x7   :  { %65 = vmatpush1.msra.mxu0 %v42_v6  ;;  %163 = vmatpush1.msra.mxu1 %v42_v6  ;;  %v29_v19 = vld [vmem:[%s316_s1 + $0x68] sm:$0xff]  ;;  %v28_v20 = vld [vmem:[%s316_s1 + $0x60] sm:$0xff]  ;;  %v27_v21 = vld [vmem:[%s316_s1 + $0x58] sm:$0xff] }
   0x8   :  { %66 = vmatprep.subr.mxu0 %v41_v7  ;;  %148 = vmatprep.subr.mxu1 %v41_v7  ;;  %v26_v22 = vld [vmem:[%s316_s1 + $0x50] sm:$0xff]  ;;  %v25_v23 = vld [vmem:[%s316_s1 + $0x48] sm:$0xff]  ;;  %v24_v24 = vld [vmem:[%s316_s1 + $0x40] sm:$0xff] }
   0x9   :  { %67 = vmatpush1.msra.mxu0 %v40_v8  ;;  %164 = vmatpush1.msra.mxu1 %v40_v8  ;;  %v23_v25 = vld [vmem:[%s316_s1 + $0x38] sm:$0xff]  ;;  %v22_v26 = vld [vmem:[%s316_s1 + $0x30] sm:$0xff]  ;;  %v21_v27 = vld [vmem:[%s316_s1 + $0x28] sm:$0xff] }
   0xa   :  { %68 = vmatprep.subr.mxu0 %v39_v9  ;;  %149 = vmatprep.subr.mxu1 %v39_v9  ;;  %v20_v28 = vld [vmem:[%s316_s1 + $0x20] sm:$0xff]  ;;  %v19_v29 = vld [vmem:[%s316_s1 + $0x18] sm:$0xff]  ;;  %v18_v30 = vld [vmem:[%s316_s1 + $0x10] sm:$0xff] }
   0xb   :  { %69 = vmatpush1.msra.mxu0 %v38_v10  ;;  %165 = vmatpush1.msra.mxu1 %v38_v10  ;;  %v17_v31 = vld [vmem:[%s316_s1 + $0x8] sm:$0xff]  ;;  %v16_v32 = vld [vmem:[%s316_s1] sm:$0xff] }
   0xc   :  { %70 = vmatprep.subr.mxu0 %v37_v11  ;;  %150 = vmatprep.subr.mxu1 %v37_v11  ;;  %v14_v33 = vld [vmem:[%s317_s0] sm:$0xff]  ;;  %v15_v34 = vld [vmem:[%s317_s0 + $0x8] sm:$0xff] }
   0xd   :  { %71 = vmatpush1.msra.mxu0 %v36_v12  ;;  %166 = vmatpush1.msra.mxu1 %v36_v12  ;;  %v48_v38 = vld [vmem:[%s318_s2] sm:$0x3] }
   0xe   :  { %72 = vmatprep.subr.mxu0 %v35_v13  ;;  %151 = vmatprep.subr.mxu1 %v35_v13  ;;  %v53_v40 = vrot.slane %v48_v38, %v52_v37  ;;  %v57_v41 = vrot.slane %v48_v38, %v56_v39 }
   0xf   :  { %73 = vmatpush1.msra.mxu0 %v34_v14  ;;  %167 = vmatpush1.msra.mxu1 %v34_v14 }
  0x10   :  { %74 = vmatprep.subr.mxu0 %v33_v15  ;;  %152 = vmatprep.subr.mxu1 %v33_v15 }
  0x11   :  { %75 = vmatpush1.msra.mxu0 %v32_v16  ;;  %168 = vmatpush1.msra.mxu1 %v32_v16 }
  0x12   :  { %76 = vmatprep.subr.mxu0 %v31_v17  ;;  %153 = vmatprep.subr.mxu1 %v31_v17 }
  0x13   :  { %77 = vmatpush1.msra.mxu0 %v30_v18  ;;  %169 = vmatpush1.msra.mxu1 %v30_v18 }
  0x14   :  { %78 = vmatprep.subr.mxu0 %v29_v19  ;;  %154 = vmatprep.subr.mxu1 %v29_v19 }
  0x15   :  { %79 = vmatpush1.msra.mxu0 %v28_v20  ;;  %170 = vmatpush1.msra.mxu1 %v28_v20 }
  0x16   :  { %80 = vmatprep.subr.mxu0 %v27_v21  ;;  %155 = vmatprep.subr.mxu1 %v27_v21 }
  0x17   :  { %81 = vmatpush1.msra.mxu0 %v26_v22  ;;  %171 = vmatpush1.msra.mxu1 %v26_v22 }
  0x18   :  { %82 = vmatprep.subr.mxu0 %v25_v23  ;;  %156 = vmatprep.subr.mxu1 %v25_v23 }
  0x19   :  { %83 = vmatpush1.msra.mxu0 %v24_v24  ;;  %172 = vmatpush1.msra.mxu1 %v24_v24 }
  0x1a   :  { %84 = vmatprep.subr.mxu0 %v23_v25  ;;  %157 = vmatprep.subr.mxu1 %v23_v25 }
  0x1b   :  { %85 = vmatpush1.msra.mxu0 %v22_v26  ;;  %173 = vmatpush1.msra.mxu1 %v22_v26 }
  0x1c   :  { %86 = vmatprep.subr.mxu0 %v21_v27  ;;  %158 = vmatprep.subr.mxu1 %v21_v27 }
  0x1d   :  { %87 = vmatpush1.msra.mxu0 %v20_v28  ;;  %174 = vmatpush1.msra.mxu1 %v20_v28 }
  0x1e   :  { %88 = vmatprep.subr.mxu0 %v19_v29  ;;  %159 = vmatprep.subr.mxu1 %v19_v29 }
  0x1f   :  { %89 = vmatpush1.msra.mxu0 %v18_v30  ;;  %175 = vmatpush1.msra.mxu1 %v18_v30 }
  0x20   :  { %90 = vmatprep.subr.mxu0 %v17_v31  ;;  %160 = vmatprep.subr.mxu1 %v17_v31 }
  0x21   :  { %91 = vmatpush1.msra.mxu0 %v16_v32  ;;  %176 = vmatpush1.msra.mxu1 %v16_v32 }
  0x22   :  { %125 = vmatmul.mubr.f32.vlgmr.msra.gmra.mxu0 %v14_v33  ;;  %131 = vmatmul.mubr.f32.vlgmr.msra.gmra.mxu1 %v15_v34 }
  0xe2   :  { %v126_v42 = vpop.f32.mrf.mxu0  ;;  %v132_v43 = vpop.f32.mrf.mxu1 }
  0xe3   :  { %v127_v44 = vadd.f32 %v126_v42, %v53_v40  ;;  %v133_v45 = vadd.f32 %v132_v43, %v53_v40 }
  0xe4   :  { %v128_v46 = vpop.f32.mrf.mxu0  ;;  %v134_v47 = vpop.f32.mrf.mxu1 }
  0xe5   :  { %137 = vst [vmem:[%s319_s3] sm:$0xff] %v127_v44  ;;  %139 = vst [vmem:[%s319_s3 + $0x10] sm:$0xff] %v133_v45  ;;  %v129_v48 = vadd.f32 %v128_v46, %v57_v41  ;;  %v135_v49 = vadd.f32 %v134_v47, %v57_v41 }
  0xe7   :  { %138 = vst [vmem:[%s319_s3 + $0x8] sm:$0xff] %v129_v48  ;;  %140 = vst [vmem:[%s319_s3 + $0x18] sm:$0xff] %v135_v49 }

// kernel: deep_recommender_forward.3
= control target key start
LH: loop header
LB: loop body
LE: loop exit
PB: predicated region body
PF: predicated region fallthrough
CT: control target
= control target key end

     0   :  { %v364_v3 = vmov 0.0   ;;  %vm60_vm0 = vcmask 261120   ;;  %v40_v25 = vlaneseq  ;;  %s628_s1 = inlined_call_operand.vmem [shape: f32[32,512], index: 1, kind: input, shape index: {}]   ;;  %s629_s0 = inlined_call_operand.vmem [shape: f32[64,32], index: 0, kind: input, shape index: {}]   ;;  %s630_s2 = inlined_call_operand.vmem [shape: f32[1,512], index: 2, kind: input, shape index: {}]   ;;  %s631_s3 = inlined_call_operand.vmem [shape: f32[64,512], index: 3, kind: output, shape index: {}]  }
   0x1   :  { %v35_v0 = vld [vmem:[%s628_s1 + $0x68] sm:$0xff]  ;;  %v37_v1 = vld [vmem:[%s628_s1 + $0x78] sm:$0xff]  ;;  %v34_v2 = vld [vmem:[%s628_s1 + $0x60] sm:$0xff]  ;;  %149 = vmatprep.mubr.f32.mxu0 %v364_v3  ;;  %262 = vmatprep.mubr.f32.mxu1 %v364_v3 }
   0x2   :  { %109 = vmatprep.subr.mxu0 %v35_v0  ;;  %222 = vmatprep.subr.mxu1 %v37_v1  ;;  %v36_v4 = vld [vmem:[%s628_s1 + $0x70] sm:$0xff]  ;;  %v31_v5 = vld [vmem:[%s628_s1 + $0x48] sm:$0xff]  ;;  %v33_v6 = vld [vmem:[%s628_s1 + $0x58] sm:$0xff]  ;;  %v41_v26 = vshrl.u32 %v40_v25, 7 }
   0x3   :  { %110 = vmatpush1.msra.mxu0 %v34_v2  ;;  %223 = vmatpush1.msra.mxu1 %v36_v4  ;;  %v30_v7 = vld [vmem:[%s628_s1 + $0x40] sm:$0xff]  ;;  %v32_v8 = vld [vmem:[%s628_s1 + $0x50] sm:$0xff]  ;;  %v27_v9 = vld [vmem:[%s628_s1 + $0x28] sm:$0xff] }
   0x4   :  { %111 = vmatprep.subr.mxu0 %v31_v5  ;;  %224 = vmatprep.subr.mxu1 %v33_v6  ;;  %v29_v10 = vld [vmem:[%s628_s1 + $0x38] sm:$0xff]  ;;  %v26_v11 = vld [vmem:[%s628_s1 + $0x20] sm:$0xff]  ;;  %v28_v12 = vld [vmem:[%s628_s1 + $0x30] sm:$0xff]  ;;  %v42_v27 = vsub.s32 0, %v41_v26  ;;  %v50_v28 = vsub.s32 2, %v41_v26  ;;  %v46_v30 = vsub.s32 1, %v41_v26 }
   0x5   :  { %112 = vmatpush1.msra.mxu0 %v30_v7  ;;  %225 = vmatpush1.msra.mxu1 %v32_v8  ;;  %v23_v13 = vld [vmem:[%s628_s1 + $0x8] sm:$0xff]  ;;  %v25_v14 = vld [vmem:[%s628_s1 + $0x18] sm:$0xff]  ;;  %v22_v15 = vld [vmem:[%s628_s1] sm:$0xff]  ;;  %v54_v31 = vsub.s32 3, %v41_v26 }
   0x6   :  { %113 = vmatprep.subr.mxu0 %v27_v9  ;;  %226 = vmatprep.subr.mxu1 %v29_v10  ;;  %v24_v16 = vld [vmem:[%s628_s1 + $0x10] sm:$0xff]  ;;  %v14_v17 = vld [vmem:[%s629_s0] sm:$0xff]  ;;  %v15_v18 = vld [vmem:[%s629_s0 + $0x8] sm:$0xff] }
   0x7   :  { %114 = vmatpush1.msra.mxu0 %v26_v11  ;;  %227 = vmatpush1.msra.mxu1 %v28_v12  ;;  %v16_v19 = vld [vmem:[%s629_s0 + $0x10] sm:$0xff]  ;;  %v17_v20 = vld [vmem:[%s629_s0 + $0x18] sm:$0xff]  ;;  %v18_v21 = vld [vmem:[%s629_s0 + $0x20] sm:$0xff] }
   0x8   :  { %115 = vmatprep.subr.mxu0 %v23_v13  ;;  %228 = vmatprep.subr.mxu1 %v25_v14  ;;  %v19_v22 = vld [vmem:[%s629_s0 + $0x28] sm:$0xff]  ;;  %v20_v23 = vld [vmem:[%s629_s0 + $0x30] sm:$0xff]  ;;  %v21_v24 = vld [vmem:[%s629_s0 + $0x38] sm:$0xff] }
   0x9   :  { %116 = vmatpush1.msra.mxu0 %v22_v15  ;;  %229 = vmatpush1.msra.mxu1 %v24_v16  ;;  %v38_v29 = vld [vmem:[%s630_s2] sm:$0xf] }
   0xa   :  { %347 = vmatmul.mubr.msk.f32.vlgmr.msra.gmra.mxu0 %vm60_vm0, %v14_v17  ;;  %355 = vmatmul.mubr.msk.f32.vlgmr.msra.gmra.mxu1 %vm60_vm0, %v14_v17  ;;  %v492_v32 = vrot.slane %v38_v29, %v42_v27  ;;  %v494_v33 = vrot.slane %v38_v29, %v50_v28  ;;  %v496_v34 = vrot.slane %v38_v29, %v46_v30 }
   0xb   :  { %155 = vmatprep.mubr.f32.mxu0 %v364_v3  ;;  %268 = vmatprep.mubr.f32.mxu1 %v364_v3  ;;  %v498_v35 = vrot.slane %v38_v29, %v54_v31 }
   0xe   :  { %348 = vmatmul.mubr.msk.f32.gmra.mxu0 %vm60_vm0, %v15_v18  ;;  %356 = vmatmul.mubr.msk.f32.gmra.mxu1 %vm60_vm0, %v15_v18 }
   0xf   :  { %161 = vmatprep.mubr.f32.mxu0 %v364_v3  ;;  %274 = vmatprep.mubr.f32.mxu1 %v364_v3 }
  0x12   :  { %349 = vmatmul.mubr.msk.f32.gmra.mxu0 %vm60_vm0, %v16_v19  ;;  %357 = vmatmul.mubr.msk.f32.gmra.mxu1 %vm60_vm0, %v16_v19 }
  0x13   :  { %167 = vmatprep.mubr.f32.mxu0 %v364_v3  ;;  %280 = vmatprep.mubr.f32.mxu1 %v364_v3 }
  0x16   :  { %350 = vmatmul.mubr.msk.f32.gmra.mxu0 %vm60_vm0, %v17_v20  ;;  %358 = vmatmul.mubr.msk.f32.gmra.mxu1 %vm60_vm0, %v17_v20 }
  0x17   :  { %173 = vmatprep.mubr.f32.mxu0 %v364_v3  ;;  %286 = vmatprep.mubr.f32.mxu1 %v364_v3 }
  0x1a   :  { %351 = vmatmul.mubr.msk.f32.gmra.mxu0 %vm60_vm0, %v18_v21  ;;  %359 = vmatmul.mubr.msk.f32.gmra.mxu1 %vm60_vm0, %v18_v21 }
  0x1b   :  { %179 = vmatprep.mubr.f32.mxu0 %v364_v3  ;;  %292 = vmatprep.mubr.f32.mxu1 %v364_v3 }
  0x1e   :  { %352 = vmatmul.mubr.msk.f32.gmra.mxu0 %vm60_vm0, %v19_v22  ;;  %360 = vmatmul.mubr.msk.f32.gmra.mxu1 %vm60_vm0, %v19_v22 }
  0x1f   :  { %185 = vmatprep.mubr.f32.mxu0 %v364_v3  ;;  %298 = vmatprep.mubr.f32.mxu1 %v364_v3 }
  0x22   :  { %353 = vmatmul.mubr.msk.f32.gmra.mxu0 %vm60_vm0, %v20_v23  ;;  %361 = vmatmul.mubr.msk.f32.gmra.mxu1 %vm60_vm0, %v20_v23 }
  0x23   :  { %191 = vmatprep.mubr.f32.mxu0 %v364_v3  ;;  %304 = vmatprep.mubr.f32.mxu1 %v364_v3 }
  0x26   :  { %354 = vmatmul.mubr.msk.f32.gmra.mxu0 %vm60_vm0, %v21_v24  ;;  %362 = vmatmul.mubr.msk.f32.gmra.mxu1 %vm60_vm0, %v21_v24 }
  0xca   :  { %v151_v36 = vpop.f32.mrf.mxu0  ;;  %v264_v37 = vpop.f32.mrf.mxu1 }
  0xcb   :  { %v152_v38 = vadd.f32 %v151_v36, %v492_v32  ;;  %v265_v39 = vadd.f32 %v264_v37, %v494_v33 }
  0xcc   :  { %v153_v40 = vpop.f32.mrf.mxu0  ;;  %v266_v41 = vpop.f32.mrf.mxu1 }
  0xcd   :  { %311 = vst [vmem:[%s631_s3] sm:$0xff] %v152_v38  ;;  %313 = vst [vmem:[%s631_s3 + $0x10] sm:$0xff] %v265_v39  ;;  %v154_v42 = vadd.f32 %v153_v40, %v496_v34  ;;  %v267_v43 = vadd.f32 %v266_v41, %v498_v35 }
  0xce   :  { %v157_v44 = vpop.f32.mrf.mxu0  ;;  %v270_v45 = vpop.f32.mrf.mxu1 }
  0xcf   :  { %312 = vst [vmem:[%s631_s3 + $0x8] sm:$0xff] %v154_v42  ;;  %314 = vst [vmem:[%s631_s3 + $0x18] sm:$0xff] %v267_v43  ;;  %v158_v46 = vadd.f32 %v157_v44, %v492_v32  ;;  %v271_v47 = vadd.f32 %v270_v45, %v494_v33 }
  0xd0   :  { %v159_v48 = vpop.f32.mrf.mxu0  ;;  %v272_v49 = vpop.f32.mrf.mxu1 }
  0xd1   :  { %315 = vst [vmem:[%s631_s3 + $0x20] sm:$0xff] %v158_v46  ;;  %317 = vst [vmem:[%s631_s3 + $0x30] sm:$0xff] %v271_v47  ;;  %v160_v50 = vadd.f32 %v159_v48, %v496_v34  ;;  %v273_v51 = vadd.f32 %v272_v49, %v498_v35 }
  0xd2   :  { %v163_v52 = vpop.f32.mrf.mxu0  ;;  %v276_v53 = vpop.f32.mrf.mxu1 }
  0xd3   :  { %316 = vst [vmem:[%s631_s3 + $0x28] sm:$0xff] %v160_v50  ;;  %318 = vst [vmem:[%s631_s3 + $0x38] sm:$0xff] %v273_v51  ;;  %v164_v54 = vadd.f32 %v163_v52, %v492_v32  ;;  %v277_v55 = vadd.f32 %v276_v53, %v494_v33 }
  0xd4   :  { %v165_v56 = vpop.f32.mrf.mxu0  ;;  %v278_v57 = vpop.f32.mrf.mxu1 }
  0xd5   :  { %319 = vst [vmem:[%s631_s3 + $0x40] sm:$0xff] %v164_v54  ;;  %321 = vst [vmem:[%s631_s3 + $0x50] sm:$0xff] %v277_v55  ;;  %v166_v58 = vadd.f32 %v165_v56, %v496_v34  ;;  %v279_v59 = vadd.f32 %v278_v57, %v498_v35 }
  0xd6   :  { %v169_v60 = vpop.f32.mrf.mxu0  ;;  %v282_v61 = vpop.f32.mrf.mxu1 }
  0xd7   :  { %320 = vst [vmem:[%s631_s3 + $0x48] sm:$0xff] %v166_v58  ;;  %322 = vst [vmem:[%s631_s3 + $0x58] sm:$0xff] %v279_v59  ;;  %v170_v62 = vadd.f32 %v169_v60, %v492_v32  ;;  %v283_v63 = vadd.f32 %v282_v61, %v494_v33 }
  0xd8   :  { %v171_v0 = vpop.f32.mrf.mxu0  ;;  %v284_v1 = vpop.f32.mrf.mxu1 }
  0xd9   :  { %323 = vst [vmem:[%s631_s3 + $0x60] sm:$0xff] %v170_v62  ;;  %325 = vst [vmem:[%s631_s3 + $0x70] sm:$0xff] %v283_v63  ;;  %v172_v2 = vadd.f32 %v171_v0, %v496_v34  ;;  %v285_v3 = vadd.f32 %v284_v1, %v498_v35 }
  0xda   :  { %v175_v4 = vpop.f32.mrf.mxu0  ;;  %v288_v5 = vpop.f32.mrf.mxu1 }
  0xdb   :  { %324 = vst [vmem:[%s631_s3 + $0x68] sm:$0xff] %v172_v2  ;;  %326 = vst [vmem:[%s631_s3 + $0x78] sm:$0xff] %v285_v3  ;;  %v176_v6 = vadd.f32 %v175_v4, %v492_v32  ;;  %v289_v7 = vadd.f32 %v288_v5, %v494_v33 }
  0xdc   :  { %v177_v8 = vpop.f32.mrf.mxu0  ;;  %v290_v9 = vpop.f32.mrf.mxu1 }
  0xdd   :  { %327 = vst [vmem:[%s631_s3 + $0x80] sm:$0xff] %v176_v6  ;;  %329 = vst [vmem:[%s631_s3 + $0x90] sm:$0xff] %v289_v7  ;;  %v178_v10 = vadd.f32 %v177_v8, %v496_v34  ;;  %v291_v11 = vadd.f32 %v290_v9, %v498_v35 }
  0xde   :  { %v181_v12 = vpop.f32.mrf.mxu0  ;;  %v294_v13 = vpop.f32.mrf.mxu1 }
  0xdf   :  { %328 = vst [vmem:[%s631_s3 + $0x88] sm:$0xff] %v178_v10  ;;  %330 = vst [vmem:[%s631_s3 + $0x98] sm:$0xff] %v291_v11  ;;  %v182_v14 = vadd.f32 %v181_v12, %v492_v32  ;;  %v295_v15 = vadd.f32 %v294_v13, %v494_v33 }
  0xe0   :  { %v183_v16 = vpop.f32.mrf.mxu0  ;;  %v296_v17 = vpop.f32.mrf.mxu1 }
  0xe1   :  { %331 = vst [vmem:[%s631_s3 + $0xa0] sm:$0xff] %v182_v14  ;;  %333 = vst [vmem:[%s631_s3 + $0xb0] sm:$0xff] %v295_v15  ;;  %v184_v18 = vadd.f32 %v183_v16, %v496_v34  ;;  %v297_v19 = vadd.f32 %v296_v17, %v498_v35 }
  0xe2   :  { %v187_v20 = vpop.f32.mrf.mxu0  ;;  %v300_v21 = vpop.f32.mrf.mxu1 }
  0xe3   :  { %332 = vst [vmem:[%s631_s3 + $0xa8] sm:$0xff] %v184_v18  ;;  %334 = vst [vmem:[%s631_s3 + $0xb8] sm:$0xff] %v297_v19  ;;  %v188_v22 = vadd.f32 %v187_v20, %v492_v32  ;;  %v301_v23 = vadd.f32 %v300_v21, %v494_v33 }
  0xe4   :  { %v189_v24 = vpop.f32.mrf.mxu0  ;;  %v302_v25 = vpop.f32.mrf.mxu1 }
  0xe5   :  { %335 = vst [vmem:[%s631_s3 + $0xc0] sm:$0xff] %v188_v22  ;;  %337 = vst [vmem:[%s631_s3 + $0xd0] sm:$0xff] %v301_v23  ;;  %v190_v26 = vadd.f32 %v189_v24, %v496_v34  ;;  %v303_v27 = vadd.f32 %v302_v25, %v498_v35 }
  0xe6   :  { %v193_v28 = vpop.f32.mrf.mxu0  ;;  %v306_v29 = vpop.f32.mrf.mxu1 }
  0xe7   :  { %336 = vst [vmem:[%s631_s3 + $0xc8] sm:$0xff] %v190_v26  ;;  %338 = vst [vmem:[%s631_s3 + $0xd8] sm:$0xff] %v303_v27  ;;  %v194_v30 = vadd.f32 %v193_v28, %v492_v32  ;;  %v307_v31 = vadd.f32 %v306_v29, %v494_v33 }
  0xe8   :  { %v195_v36 = vpop.f32.mrf.mxu0  ;;  %v308_v37 = vpop.f32.mrf.mxu1 }
  0xe9   :  { %339 = vst [vmem:[%s631_s3 + $0xe0] sm:$0xff] %v194_v30  ;;  %341 = vst [vmem:[%s631_s3 + $0xf0] sm:$0xff] %v307_v31  ;;  %v196_v38 = vadd.f32 %v195_v36, %v496_v34  ;;  %v309_v39 = vadd.f32 %v308_v37, %v498_v35 }
  0xeb   :  { %340 = vst [vmem:[%s631_s3 + $0xe8] sm:$0xff] %v196_v38  ;;  %342 = vst [vmem:[%s631_s3 + $0xf8] sm:$0xff] %v309_v39 }

// kernel: deep_recommender_forward.4
= control target key start
LH: loop header
LB: loop body
LE: loop exit
PB: predicated region body
PF: predicated region fallthrough
CT: control target
= control target key end

     0   :  { %v3094_v3 = vmov 0.0   ;;  %s3089_s1 = inlined_call_operand.vmem [shape: f32[128,512], index: 1, kind: input, shape index: {}]   ;;  %s3090_s0 = inlined_call_operand.vmem [shape: f32[8,8,512], index: 0, kind: input, shape index: {}]   ;;  %s3091_s2 = inlined_call_operand.vmem [shape: f32[8,8,128], index: 2, kind: output, shape index: {}]  }
   0x1   :  { %v1778_v0 = vld [vmem:[%s3089_s1 + $0x1e8] sm:$0xff]  ;;  %v1783_v1 = vld [vmem:[%s3089_s1 + $0x1e0] sm:$0xff]  ;;  %150 = vmatprep.mubr.f32.mxu0 %v3094_v3  ;;  %221 = vmatprep.mubr.f32.mxu1 %v3094_v3  ;;  %v1825_v9 = vld [vmem:[%s3089_s1 + $0x1f8] sm:$0xff] }
   0x2   :  { %3166 = vst [vmem:[#allocation4_spill] sm:$0xff] %v1778_v0  ;;  %v1788_v2 = vld [vmem:[%s3089_s1 + $0x1c8] sm:$0xff]  ;;  %86 = vmatprep.subr.mxu0 %v1778_v0  ;;  %v1796_v4 = vld [vmem:[%s3089_s1 + $0x1c0] sm:$0xff]  ;;  %3167 = vst [vmem:[#allocation5_spill] sm:$0xff] %v1825_v9  ;;  %157 = vmatprep.subr.mxu1 %v1825_v9 }
   0x3   :  { %87 = vmatpush1.msra.mxu0 %v1783_v1  ;;  %v1802_v5 = vld [vmem:[%s3089_s1 + $0x1a8] sm:$0xff]  ;;  %v1808_v6 = vld [vmem:[%s3089_s1 + $0x1a0] sm:$0xff]  ;;  %v1837_v11 = vld [vmem:[%s3089_s1 + $0x1f0] sm:$0xff] }
   0x4   :  { %88 = vmatprep.subr.mxu0 %v1788_v2  ;;  %v1814_v7 = vld [vmem:[%s3089_s1 + $0x188] sm:$0xff]  ;;  %v1820_v8 = vld [vmem:[%s3089_s1 + $0x180] sm:$0xff]  ;;  %158 = vmatpush1.msra.mxu1 %v1837_v11  ;;  %v1849_v13 = vld [vmem:[%s3089_s1 + $0x1d8] sm:$0xff] }
   0x5   :  { %89 = vmatpush1.msra.mxu0 %v1796_v4  ;;  %v1831_v10 = vld [vmem:[%s3089_s1 + $0x168] sm:$0xff]  ;;  %v1843_v12 = vld [vmem:[%s3089_s1 + $0x160] sm:$0xff]  ;;  %v1854_v14 = vld [vmem:[%s3089_s1 + $0x1d0] sm:$0xff]  ;;  %159 = vmatprep.subr.mxu1 %v1849_v13 }
   0x6   :  { %90 = vmatprep.subr.mxu0 %v1802_v5  ;;  %v1860_v15 = vld [vmem:[%s3089_s1 + $0x148] sm:$0xff]  ;;  %v1866_v16 = vld [vmem:[%s3089_s1 + $0x1b8] sm:$0xff]  ;;  %v1872_v17 = vld [vmem:[%s3089_s1 + $0x140] sm:$0xff]  ;;  %160 = vmatpush1.msra.mxu1 %v1854_v14 }
   0x7   :  { %91 = vmatpush1.msra.mxu0 %v1808_v6  ;;  %v1878_v18 = vld [vmem:[%s3089_s1 + $0x1b0] sm:$0xff]  ;;  %v1883_v19 = vld [vmem:[%s3089_s1 + $0x198] sm:$0xff]  ;;  %v1889_v20 = vld [vmem:[%s3089_s1 + $0x128] sm:$0xff]  ;;  %161 = vmatprep.subr.mxu1 %v1866_v16 }
   0x8   :  { %92 = vmatprep.subr.mxu0 %v1814_v7  ;;  %v1895_v21 = vld [vmem:[%s3089_s1 + $0x190] sm:$0xff]  ;;  %v1901_v22 = vld [vmem:[%s3089_s1 + $0x120] sm:$0xff]  ;;  %162 = vmatpush1.msra.mxu1 %v1878_v18  ;;  %v1907_v23 = vld [vmem:[%s3089_s1 + $0x178] sm:$0xff] }
   0x9   :  { %93 = vmatpush1.msra.mxu0 %v1820_v8  ;;  %v1913_v24 = vld [vmem:[%s3089_s1 + $0x108] sm:$0xff]  ;;  %163 = vmatprep.subr.mxu1 %v1883_v19  ;;  %v1919_v25 = vld [vmem:[%s3089_s1 + $0x170] sm:$0xff]  ;;  %v1925_v26 = vld [vmem:[%s3089_s1 + $0x100] sm:$0xff] }
   0xa   :  { %94 = vmatprep.subr.mxu0 %v1831_v10  ;;  %164 = vmatpush1.msra.mxu1 %v1895_v21  ;;  %v1931_v27 = vld [vmem:[%s3089_s1 + $0x158] sm:$0xff]  ;;  %v1937_v28 = vld [vmem:[%s3089_s1 + $0xe8] sm:$0xff]  ;;  %v1943_v29 = vld [vmem:[%s3089_s1 + $0x150] sm:$0xff] }
   0xb   :  { %95 = vmatpush1.msra.mxu0 %v1843_v12  ;;  %165 = vmatprep.subr.mxu1 %v1907_v23  ;;  %v1949_v30 = vld [vmem:[%s3089_s1 + $0xe0] sm:$0xff]  ;;  %v1955_v31 = vld [vmem:[%s3089_s1 + $0x138] sm:$0xff]  ;;  %v1961_v32 = vld [vmem:[%s3089_s1 + $0xc8] sm:$0xff] }
   0xc   :  { %96 = vmatprep.subr.mxu0 %v1860_v15  ;;  %166 = vmatpush1.msra.mxu1 %v1919_v25  ;;  %v1967_v33 = vld [vmem:[%s3089_s1 + $0x130] sm:$0xff]  ;;  %v1973_v34 = vld [vmem:[%s3089_s1 + $0xc0] sm:$0xff]  ;;  %v1979_v35 = vld [vmem:[%s3089_s1 + $0x118] sm:$0xff] }
   0xd   :  { %97 = vmatpush1.msra.mxu0 %v1872_v17  ;;  %167 = vmatprep.subr.mxu1 %v1931_v27  ;;  %v1985_v36 = vld [vmem:[%s3089_s1 + $0xa8] sm:$0xff]  ;;  %v1991_v37 = vld [vmem:[%s3089_s1 + $0x110] sm:$0xff]  ;;  %v1997_v38 = vld [vmem:[%s3089_s1 + $0xa0] sm:$0xff] }
   0xe   :  { %98 = vmatprep.subr.mxu0 %v1889_v20  ;;  %168 = vmatpush1.msra.mxu1 %v1943_v29  ;;  %v2003_v39 = vld [vmem:[%s3089_s1 + $0xf8] sm:$0xff]  ;;  %v2009_v40 = vld [vmem:[%s3089_s1 + $0x88] sm:$0xff]  ;;  %v2015_v41 = vld [vmem:[%s3089_s1 + $0xf0] sm:$0xff] }
   0xf   :  { %99 = vmatpush1.msra.mxu0 %v1901_v22  ;;  %169 = vmatprep.subr.mxu1 %v1955_v31  ;;  %v2021_v42 = vld [vmem:[%s3089_s1 + $0x80] sm:$0xff]  ;;  %v2027_v43 = vld [vmem:[%s3089_s1 + $0xd8] sm:$0xff]  ;;  %v2033_v44 = vld [vmem:[%s3089_s1 + $0x68] sm:$0xff] }
  0x10   :  { %100 = vmatprep.subr.mxu0 %v1913_v24  ;;  %170 = vmatpush1.msra.mxu1 %v1967_v33  ;;  %3168 = vst [vmem:[#allocation6_spill] sm:$0xff] %v2033_v44  ;;  %v2039_v45 = vld [vmem:[%s3089_s1 + $0xd0] sm:$0xff]  ;;  %v2045_v46 = vld [vmem:[%s3089_s1 + $0x60] sm:$0xff]  ;;  %v2051_v47 = vld [vmem:[%s3089_s1 + $0xb8] sm:$0xff] }
  0x11   :  { %101 = vmatpush1.msra.mxu0 %v1925_v26  ;;  %171 = vmatprep.subr.mxu1 %v1979_v35  ;;  %3169 = vst [vmem:[#allocation7_spill] sm:$0xff] %v2045_v46  ;;  %v2057_v48 = vld [vmem:[%s3089_s1 + $0x48] sm:$0xff]  ;;  %v2063_v49 = vld [vmem:[%s3089_s1 + $0xb0] sm:$0xff]  ;;  %v2069_v50 = vld [vmem:[%s3089_s1 + $0x40] sm:$0xff] }
  0x12   :  { %102 = vmatprep.subr.mxu0 %v1937_v28  ;;  %172 = vmatpush1.msra.mxu1 %v1991_v37  ;;  %3170 = vst [vmem:[#allocation8_spill] sm:$0xff] %v2057_v48  ;;  %3171 = vst [vmem:[#allocation9_spill] sm:$0xff] %v2069_v50  ;;  %v2075_v51 = vld [vmem:[%s3089_s1 + $0x98] sm:$0xff]  ;;  %v2081_v52 = vld [vmem:[%s3089_s1 + $0x28] sm:$0xff] }
  0x13   :  { %103 = vmatpush1.msra.mxu0 %v1949_v30  ;;  %173 = vmatprep.subr.mxu1 %v2003_v39  ;;  %3172 = vst [vmem:[#allocation10_spill] sm:$0xff] %v2081_v52  ;;  %v2087_v53 = vld [vmem:[%s3089_s1 + $0x90] sm:$0xff]  ;;  %v2093_v54 = vld [vmem:[%s3089_s1 + $0x20] sm:$0xff]  ;;  %v2099_v55 = vld [vmem:[%s3089_s1 + $0x78] sm:$0xff] }
  0x14   :  { %104 = vmatprep.subr.mxu0 %v1961_v32  ;;  %174 = vmatpush1.msra.mxu1 %v2015_v41  ;;  %3173 = vst [vmem:[#allocation11_spill] sm:$0xff] %v2093_v54  ;;  %3174 = vst [vmem:[#allocation12_spill] sm:$0xff] %v2099_v55  ;;  %v2105_v56 = vld [vmem:[%s3089_s1 + $0x8] sm:$0xff]  ;;  %v2111_v57 = vld [vmem:[%s3089_s1 + $0x70] sm:$0xff] }
  0x15   :  { %105 = vmatpush1.msra.mxu0 %v1973_v34  ;;  %175 = vmatprep.subr.mxu1 %v2027_v43  ;;  %3175 = vst [vmem:[#allocation13_spill] sm:$0xff] %v2105_v56  ;;  %3176 = vst [vmem:[#allocation14_spill] sm:$0xff] %v2111_v57  ;;  %v2117_v58 = vld [vmem:[%s3089_s1] sm:$0xff]  ;;  %v2123_v59 = vld [vmem:[%s3089_s1 + $0x58] sm:$0xff] }
  0x16   :  { %106 = vmatprep.subr.mxu0 %v1985_v36  ;;  %176 = vmatpush1.msra.mxu1 %v2039_v45  ;;  %3177 = vst [vmem:[#allocation15_spill] sm:$0xff] %v2117_v58  ;;  %3178 = vst [vmem:[#allocation16_spill] sm:$0xff] %v2123_v59  ;;  %v2130_v60 = vld [vmem:[%s3089_s1 + $0x50] sm:$0xff]  ;;  %v2137_v61 = vld [vmem:[%s3089_s1 + $0x38] sm:$0xff] }
  0x17   :  { %107 = vmatpush1.msra.mxu0 %v1997_v38  ;;  %177 = vmatprep.subr.mxu1 %v2051_v47  ;;  %3179 = vst [vmem:[#allocation17_spill] sm:$0xff] %v2130_v60  ;;  %3180 = vst [vmem:[#allocation18_spill] sm:$0xff] %v2137_v61  ;;  %v2144_v62 = vld [vmem:[%s3089_s1 + $0x30] sm:$0xff]  ;;  %v2151_v63 = vld [vmem:[%s3089_s1 + $0x18] sm:$0xff] }
  0x18   :  { %108 = vmatprep.subr.mxu0 %v2009_v40  ;;  %178 = vmatpush1.msra.mxu1 %v2063_v49  ;;  %3181 = vst [vmem:[#allocation19_spill] sm:$0xff] %v2144_v62  ;;  %3182 = vst [vmem:[#allocation20_spill] sm:$0xff] %v2151_v63 }
  0x19   :  { %109 = vmatpush1.msra.mxu0 %v2021_v42  ;;  %179 = vmatprep.subr.mxu1 %v2075_v51 }
  0x1a   :  { %110 = vmatprep.subr.mxu0 %v2033_v44  ;;  %180 = vmatpush1.msra.mxu1 %v2087_v53 }
  0x1b   :  { %111 = vmatpush1.msra.mxu0 %v2045_v46  ;;  %181 = vmatprep.subr.mxu1 %v2099_v55 }
  0x1c   :  { %112 = vmatprep.subr.mxu0 %v2057_v48  ;;  %182 = vmatpush1.msra.mxu1 %v2111_v57 }
  0x1d   :  { %113 = vmatpush1.msra.mxu0 %v2069_v50  ;;  %183 = vmatprep.subr.mxu1 %v2123_v59 }
  0x1e   :  { %114 = vmatprep.subr.mxu0 %v2081_v52  ;;  %184 = vmatpush1.msra.mxu1 %v2130_v60 }
  0x1f   :  { %115 = vmatpush1.msra.mxu0 %v2093_v54  ;;  %185 = vmatprep.subr.mxu1 %v2137_v61 }
  0x20   :  { %116 = vmatprep.subr.mxu0 %v2105_v56  ;;  %186 = vmatpush1.msra.mxu1 %v2144_v62 }
  0x21   :  { %117 = vmatpush1.msra.mxu0 %v2117_v58  ;;  %v2157_v58 = vld [vmem:[%s3089_s1 + $0x10] sm:$0xff]  ;;  %187 = vmatprep.subr.mxu1 %v2151_v63 }
  0x22   :  { %151 = vmatmul.mubr.f32.vlgmr.msra.gmra.mxu0 %v3094_v3  ;;  %3183 = vst [vmem:[#allocation21_spill] sm:$0xff] %v2157_v58  ;;  %266 = vmatprep.subr.mxu0 %v1778_v0 }
  0x23   :  { %267 = vmatpush1.msra.mxu0 %v1783_v1  ;;  %188 = vmatpush1.msra.mxu1 %v2157_v58 }
  0x24   :  { %268 = vmatprep.subr.mxu0 %v1788_v2  ;;  %222 = vmatmul.mubr.f32.vlgmr.msra.gmra.mxu1 %v3094_v3  ;;  %v3184_v3 = vld [vmem:[#allocation15_spill] sm:$0xff] }
  0x25   :  { %269 = vmatpush1.msra.mxu0 %v1796_v4  ;;  %337 = vmatprep.subr.mxu1 %v1825_v9 }
  0x26   :  { %338 = vmatpush1.msra.mxu1 %v1837_v11  ;;  %270 = vmatprep.subr.mxu0 %v1802_v5 }
  0x27   :  { %339 = vmatprep.subr.mxu1 %v1849_v13  ;;  %271 = vmatpush1.msra.mxu0 %v1808_v6 }
  0x28   :  { %340 = vmatpush1.msra.mxu1 %v1854_v14  ;;  %272 = vmatprep.subr.mxu0 %v1814_v7 }
  0x29   :  { %341 = vmatprep.subr.mxu1 %v1866_v16  ;;  %273 = vmatpush1.msra.mxu0 %v1820_v8 }
  0x2a   :  { %342 = vmatpush1.msra.mxu1 %v1878_v18  ;;  %274 = vmatprep.subr.mxu0 %v1831_v10 }
  0x2b   :  { %343 = vmatprep.subr.mxu1 %v1883_v19  ;;  %275 = vmatpush1.msra.mxu0 %v1843_v12 }
  0x2c   :  { %344 = vmatpush1.msra.mxu1 %v1895_v21  ;;  %276 = vmatprep.subr.mxu0 %v1860_v15 }
  0x2d   :  { %345 = vmatprep.subr.mxu1 %v1907_v23  ;;  %277 = vmatpush1.msra.mxu0 %v1872_v17 }
  0x2e   :  { %346 = vmatpush1.msra.mxu1 %v1919_v25  ;;  %278 = vmatprep.subr.mxu0 %v1889_v20 }
  0x2f   :  { %347 = vmatprep.subr.mxu1 %v1931_v27  ;;  %279 = vmatpush1.msra.mxu0 %v1901_v22 }
  0x30   :  { %348 = vmatpush1.msra.mxu1 %v1943_v29  ;;  %280 = vmatprep.subr.mxu0 %v1913_v24 }
  0x31   :  { %349 = vmatprep.subr.mxu1 %v1955_v31  ;;  %281 = vmatpush1.msra.mxu0 %v1925_v26 }
  0x32   :  { %350 = vmatpush1.msra.mxu1 %v1967_v33  ;;  %282 = vmatprep.subr.mxu0 %v1937_v28 }
  0x33   :  { %351 = vmatprep.subr.mxu1 %v1979_v35  ;;  %283 = vmatpush1.msra.mxu0 %v1949_v30 }
  0x34   :  { %352 = vmatpush1.msra.mxu1 %v1991_v37  ;;  %284 = vmatprep.subr.mxu0 %v1961_v32 }
  0x35   :  { %353 = vmatprep.subr.mxu1 %v2003_v39  ;;  %285 = vmatpush1.msra.mxu0 %v1973_v34 }
  0x36   :  { %354 = vmatpush1.msra.mxu1 %v2015_v41  ;;  %286 = vmatprep.subr.mxu0 %v1985_v36 }
  0x37   :  { %355 = vmatprep.subr.mxu1 %v2027_v43  ;;  %287 = vmatpush1.msra.mxu0 %v1997_v38 }
  0x38   :  { %356 = vmatpush1.msra.mxu1 %v2039_v45  ;;  %288 = vmatprep.subr.mxu0 %v2009_v40 }
  0x39   :  { %357 = vmatprep.subr.mxu1 %v2051_v47  ;;  %289 = vmatpush1.msra.mxu0 %v2021_v42 }
  0x3a   :  { %358 = vmatpush1.msra.mxu1 %v2063_v49  ;;  %290 = vmatprep.subr.mxu0 %v2033_v44 }
  0x3b   :  { %359 = vmatprep.subr.mxu1 %v2075_v51  ;;  %291 = vmatpush1.msra.mxu0 %v2045_v46 }
  0x3c   :  { %360 = vmatpush1.msra.mxu1 %v2087_v53  ;;  %292 = vmatprep.subr.mxu0 %v2057_v48  ;;  %v3185_v48 = vmov 0.0  }
  0x3d   :  { %361 = vmatprep.subr.mxu1 %v2099_v55  ;;  %293 = vmatpush1.msra.mxu0 %v2069_v50 }
  0x3e   :  { %362 = vmatpush1.msra.mxu1 %v2111_v57  ;;  %294 = vmatprep.subr.mxu0 %v2081_v52 }
  0x3f   :  { %363 = vmatprep.subr.mxu1 %v2123_v59  ;;  %295 = vmatpush1.msra.mxu0 %v2093_v54 }
  0x40   :  { %364 = vmatpush1.msra.mxu1 %v2130_v60  ;;  %296 = vmatprep.subr.mxu0 %v2105_v56  ;;  %v81_v56 = vld [vmem:[%s3090_s0] sm:$0xff] }
  0x41   :  { %365 = vmatprep.subr.mxu1 %v2137_v61  ;;  %297 = vmatpush1.msra.mxu0 %v3184_v3  ;;  %v82_v3 = vld [vmem:[%s3090_s0 + $0x8] sm:$0xff] }
  0x42   :  { %366 = vmatpush1.msra.mxu1 %v2144_v62  ;;  %330 = vmatprep.mubr.f32.mxu0 %v3185_v48 }
  0x43   :  { %367 = vmatprep.subr.mxu1 %v2151_v63  ;;  %401 = vmatprep.mubr.f32.mxu1 %v3185_v48 }
  0x44   :  { %368 = vmatpush1.msra.mxu1 %v2157_v58  ;;  %447 = vmatprep.subr.mxu0 %v1778_v0 }
  0x45   :  { %518 = vmatprep.subr.mxu1 %v1825_v9  ;;  %v84_v9 = vld [vmem:[%s3090_s0 + $0x18] sm:$0xff] }
  0xe2   :  { %v152_v54 = vpop.f32.mrf.mxu0 }
  0xe3   :  { %v228_v62 = vadd.f32 %v152_v54, %v81_v56  ;;  %v83_v54 = vld [vmem:[%s3090_s0 + $0x10] sm:$0xff] }
  0xe4   :  { %v154_v61 = vpop.f32.mrf.mxu0  ;;  %v223_v58 = vpop.f32.mrf.mxu1 }
  0xe5   :  { %v232_v63 = vsub.f32 0.0, %v228_v62  ;;  %v229_v52 = vadd.f32 %v154_v61, %v82_v3  ;;  %v230_v3 = vadd.f32 %v223_v58, %v83_v54 }
  0xe6   :  { %v225_v50 = vpop.f32.mrf.mxu1 }
  0xe7   :  { %v233_v48 = vmul.f32 1.442695, %v232_v63  ;;  %v238_v60 = vsub.f32 0.0, %v229_v52  ;;  %v231_v59 = vadd.f32 %v225_v50, %v84_v9 }
  0xe9   :  { %1567 = vpow2.f32 %v233_v48  ;;  %v239_v0 = vmul.f32 1.442695, %v238_v60  ;;  %v245_v57 = vsub.f32 0.0, %v231_v59 }
  0xeb   :  { %1569 = vpow2.f32 %v239_v0  ;;  %v246_v56 = vmul.f32 1.442695, %v245_v57 }
  0xed   :  { %1571 = vpow2.f32 %v246_v56  ;;  %v3187_v56 = vld [vmem:[#allocation7_spill] sm:$0xff] }
  0xf6   :  { %v1568_v62 = vpop.eup %1567 }
  0xf7   :  { %v235_v61 = vadd.f32 1.0, %v1568_v62  ;;  %v3188_v62 = vld [vmem:[#allocation14_spill] sm:$0xff] }
  0xf8   :  { %v1570_v52 = vpop.eup %1569 }
  0xf9   :  { %1573 = vrcp.f32 %v235_v61  ;;  %v241_v48 = vadd.f32 1.0, %v1570_v52  ;;  %v3190_v61 = vld [vmem:[#allocation16_spill] sm:$0xff]  ;;  %v3191_v52 = vld [vmem:[#allocation9_spill] sm:$0xff] }
  0xfa   :  { %1575 = vtanh.f32 %v230_v3  ;;  %v1572_v60 = vpop.eup %1571  ;;  %v3189_v3 = vld [vmem:[#allocation8_spill] sm:$0xff] }
  0xfb   :  { %1577 = vrcp.f32 %v241_v48  ;;  %v248_v9 = vadd.f32 1.0, %v1572_v60  ;;  %v3192_v48 = vld [vmem:[#allocation17_spill] sm:$0xff]  ;;  %v3193_v60 = vld [vmem:[#allocation10_spill] sm:$0xff] }
  0xfd   :  { %1579 = vrcp.f32 %v248_v9  ;;  %v3196_v9 = vld [vmem:[#allocation19_spill] sm:$0xff] }
 0x106   :  { %v1574_v63 = vpop.eup %1573 }
 0x107   :  { %v1576_v46 = vpop.eup %1575 }
 0x108   :  { %v1578_v0 = vpop.eup %1577  ;;  %v253_v59 = vmul.f32 %v1576_v46, %v1574_v63  ;;  %v3186_v46 = vld [vmem:[#allocation12_spill] sm:$0xff]  ;;  %v3194_v63 = vld [vmem:[#allocation18_spill] sm:$0xff] }
 0x109   :  { %v252_v50 = vmul.f32 0.0, %v1578_v0  ;;  %v3195_v0 = vld [vmem:[#allocation11_spill] sm:$0xff] }
 0x10a   :  { %v1580_v57 = vpop.eup %1579 }
 0x10b   :  { %v2243_v55 = vadd.f32 %v253_v59, %v252_v50  ;;  %v3197_v50 = vld [vmem:[#allocation13_spill] sm:$0xff]  ;;  %v3198_v59 = vld [vmem:[#allocation20_spill] sm:$0xff] }
 0x10d   :  { %1581 = vtanh.f32 %v2243_v55 }
 0x11a   :  { %v1582_v58 = vpop.eup %1581 }
 0x11b   :  { %v256_v54 = vmul.f32 %v1582_v58, %v1580_v57  ;;  %v3199_v57 = vld [vmem:[#allocation15_spill] sm:$0xff]  ;;  %v3200_v58 = vmov 0.0  }
 0x11d   :  { %259 = vst [vmem:[%s3091_s2] sm:$0xff] %v256_v54  ;;  %331 = vmatmul.mubr.f32.vlgmr.msra.gmra.mxu0 %v256_v54  ;;  %402 = vmatmul.mubr.f32.vlgmr.msra.gmra.mxu1 %v256_v54  ;;  %v3201_v54 = vld [vmem:[#allocation21_spill] sm:$0xff] }
 0x11e   :  { %448 = vmatpush1.msra.mxu0 %v1783_v1  ;;  %519 = vmatpush1.msra.mxu1 %v1837_v11 }
 0x11f   :  { %449 = vmatprep.subr.mxu0 %v1788_v2  ;;  %520 = vmatprep.subr.mxu1 %v1849_v13 }
 0x120   :  { %450 = vmatpush1.msra.mxu0 %v1796_v4  ;;  %521 = vmatpush1.msra.mxu1 %v1854_v14 }
 0x121   :  { %451 = vmatprep.subr.mxu0 %v1802_v5  ;;  %522 = vmatprep.subr.mxu1 %v1866_v16 }
 0x122   :  { %452 = vmatpush1.msra.mxu0 %v1808_v6  ;;  %523 = vmatpush1.msra.mxu1 %v1878_v18 }
 0x123   :  { %453 = vmatprep.subr.mxu0 %v1814_v7  ;;  %524 = vmatprep.subr.mxu1 %v1883_v19 }
 0x124   :  { %454 = vmatpush1.msra.mxu0 %v1820_v8  ;;  %525 = vmatpush1.msra.mxu1 %v1895_v21 }
 0x125   :  { %455 = vmatprep.subr.mxu0 %v1831_v10  ;;  %526 = vmatprep.subr.mxu1 %v1907_v23 }
 0x126   :  { %456 = vmatpush1.msra.mxu0 %v1843_v12  ;;  %527 = vmatpush1.msra.mxu1 %v1919_v25 }
 0x127   :  { %457 = vmatprep.subr.mxu0 %v1860_v15  ;;  %528 = vmatprep.subr.mxu1 %v1931_v27 }
 0x128   :  { %458 = vmatpush1.msra.mxu0 %v1872_v17  ;;  %529 = vmatpush1.msra.mxu1 %v1943_v29 }
 0x129   :  { %459 = vmatprep.subr.mxu0 %v1889_v20  ;;  %530 = vmatprep.subr.mxu1 %v1955_v31 }
 0x12a   :  { %460 = vmatpush1.msra.mxu0 %v1901_v22  ;;  %531 = vmatpush1.msra.mxu1 %v1967_v33 }
 0x12b   :  { %461 = vmatprep.subr.mxu0 %v1913_v24  ;;  %532 = vmatprep.subr.mxu1 %v1979_v35 }
 0x12c   :  { %462 = vmatpush1.msra.mxu0 %v1925_v26  ;;  %533 = vmatpush1.msra.mxu1 %v1991_v37 }
 0x12d   :  { %463 = vmatprep.subr.mxu0 %v1937_v28  ;;  %534 = vmatprep.subr.mxu1 %v2003_v39 }
 0x12e   :  { %464 = vmatpush1.msra.mxu0 %v1949_v30  ;;  %535 = vmatpush1.msra.mxu1 %v2015_v41 }
 0x12f   :  { %465 = vmatprep.subr.mxu0 %v1961_v32  ;;  %536 = vmatprep.subr.mxu1 %v2027_v43 }
 0x130   :  { %466 = vmatpush1.msra.mxu0 %v1973_v34  ;;  %537 = vmatpush1.msra.mxu1 %v2039_v45 }
 0x131   :  { %467 = vmatprep.subr.mxu0 %v1985_v36  ;;  %538 = vmatprep.subr.mxu1 %v2051_v47 }
 0x132   :  { %468 = vmatpush1.msra.mxu0 %v1997_v38  ;;  %539 = vmatpush1.msra.mxu1 %v2063_v49 }
 0x133   :  { %469 = vmatprep.subr.mxu0 %v2009_v40  ;;  %540 = vmatprep.subr.mxu1 %v2075_v51 }
 0x134   :  { %470 = vmatpush1.msra.mxu0 %v2021_v42  ;;  %541 = vmatpush1.msra.mxu1 %v2087_v53 }
 0x135   :  { %471 = vmatprep.subr.mxu0 %v2033_v44  ;;  %542 = vmatprep.subr.mxu1 %v3186_v46 }
 0x136   :  { %472 = vmatpush1.msra.mxu0 %v3187_v56  ;;  %543 = vmatpush1.msra.mxu1 %v3188_v62 }
 0x137   :  { %473 = vmatprep.subr.mxu0 %v3189_v3  ;;  %544 = vmatprep.subr.mxu1 %v3190_v61 }
 0x138   :  { %474 = vmatpush1.msra.mxu0 %v3191_v52  ;;  %545 = vmatpush1.msra.mxu1 %v3192_v48  ;;  %v3202_v48 = vld [vmem:[#allocation4_spill] sm:$0xff] }
 0x139   :  { %475 = vmatprep.subr.mxu0 %v3193_v60  ;;  %546 = vmatprep.subr.mxu1 %v3194_v63  ;;  %v3203_v60 = vld [vmem:[#allocation5_spill] sm:$0xff] }
 0x13a   :  { %476 = vmatpush1.msra.mxu0 %v3195_v0  ;;  %547 = vmatpush1.msra.mxu1 %v3196_v9  ;;  %v1531_v9 = vld [vmem:[%s3090_s0 + $0x20] sm:$0xff] }
 0x13b   :  { %477 = vmatprep.subr.mxu0 %v3197_v50  ;;  %548 = vmatprep.subr.mxu1 %v3198_v59  ;;  %v1532_v59 = vld [vmem:[%s3090_s0 + $0x28] sm:$0xff] }
 0x13c   :  { %478 = vmatpush1.msra.mxu0 %v3199_v57  ;;  %511 = vmatprep.mubr.f32.mxu0 %v3200_v58 }
 0x13d   :  { %549 = vmatpush1.msra.mxu1 %v3201_v54  ;;  %582 = vmatprep.mubr.f32.mxu1 %v3200_v58 }
 0x13e   :  { %628 = vmatprep.subr.mxu0 %v3202_v48  ;;  %699 = vmatprep.subr.mxu1 %v3203_v60  ;;  %v1534_v60 = vld [vmem:[%s3090_s0 + $0x38] sm:$0xff] }
 0x1dd   :  { %v332_v0 = vpop.f32.mrf.mxu0  ;;  %v403_v52 = vpop.f32.mrf.mxu1 }
 0x1de   :  { %v408_v57 = vadd.f32 %v1531_v9, %v332_v0  ;;  %v1533_v0 = vld [vmem:[%s3090_s0 + $0x30] sm:$0xff] }
 0x1df   :  { %v334_v50 = vpop.f32.mrf.mxu0  ;;  %v405_v3 = vpop.f32.mrf.mxu1  ;;  %v410_v46 = vadd.f32 %v1533_v0, %v403_v52 }
 0x1e0   :  { %v412_v63 = vsub.f32 0.0, %v408_v57  ;;  %v409_v54 = vadd.f32 %v1532_v59, %v334_v50  ;;  %v411_v62 = vadd.f32 %v1534_v60, %v405_v3 }
 0x1e2   :  { %v413_v61 = vmul.f32 1.442695, %v412_v63  ;;  %v418_v58 = vsub.f32 0.0, %v409_v54  ;;  %v425_v56 = vsub.f32 0.0, %v411_v62 }
 0x1e4   :  { %1583 = vpow2.f32 %v413_v61  ;;  %v419_v48 = vmul.f32 1.442695, %v418_v58  ;;  %v426_v9 = vmul.f32 1.442695, %v425_v56 }
 0x1e6   :  { %1585 = vpow2.f32 %v419_v48 }
 0x1e7   :  { %1587 = vpow2.f32 %v426_v9  ;;  %v3206_v9 = vld [vmem:[#allocation7_spill] sm:$0xff] }
 0x1f1   :  { %v1584_v57 = vpop.eup %1583 }
 0x1f2   :  { %v415_v50 = vadd.f32 1.0, %v1584_v57  ;;  %v3207_v57 = vld [vmem:[#allocation14_spill] sm:$0xff] }
 0x1f3   :  { %v1586_v63 = vpop.eup %1585 }
 0x1f4   :  { %1589 = vrcp.f32 %v415_v50  ;;  %v421_v61 = vadd.f32 1.0, %v1586_v63  ;;  %v1588_v59 = vpop.eup %1587  ;;  %v3208_v50 = vld [vmem:[#allocation8_spill] sm:$0xff] }
 0x1f5   :  { %1591 = vtanh.f32 %v410_v46  ;;  %v428_v3 = vadd.f32 1.0, %v1588_v59  ;;  %v3205_v46 = vld [vmem:[#allocation12_spill] sm:$0xff]  ;;  %v3211_v59 = vld [vmem:[#allocation17_spill] sm:$0xff] }
 0x1f6   :  { %1593 = vrcp.f32 %v421_v61  ;;  %v3209_v63 = vld [vmem:[#allocation16_spill] sm:$0xff]  ;;  %v3210_v61 = vld [vmem:[#allocation9_spill] sm:$0xff] }
 0x1f7   :  { %1595 = vrcp.f32 %v428_v3  ;;  %v3215_v3 = vld [vmem:[#allocation19_spill] sm:$0xff] }
 0x201   :  { %v1590_v58 = vpop.eup %1589 }
 0x202   :  { %v1592_v54 = vpop.eup %1591 }
 0x203   :  { %v1594_v48 = vpop.eup %1593  ;;  %v433_v62 = vmul.f32 %v1592_v54, %v1590_v58  ;;  %v3212_v58 = vld [vmem:[#allocation10_spill] sm:$0xff] }
 0x204   :  { %v432_v60 = vmul.f32 %v1594_v48, %v2243_v55  ;;  %v1596_v56 = vpop.eup %1595  ;;  %v3204_v55 = vld [vmem:[#allocation6_spill] sm:$0xff]  ;;  %v3214_v48 = vld [vmem:[#allocation11_spill] sm:$0xff] }
 0x205   :  { %v3213_v54 = vld [vmem:[#allocation18_spill] sm:$0xff] }
 0x206   :  { %v2328_v44 = vadd.f32 %v433_v62, %v432_v60  ;;  %v3216_v62 = vld [vmem:[#allocation13_spill] sm:$0xff]  ;;  %v3217_v60 = vld [vmem:[#allocation20_spill] sm:$0xff] }
 0x208   :  { %1597 = vtanh.f32 %v2328_v44 }
 0x215   :  { %v1598_v52 = vpop.eup %1597 }
 0x216   :  { %v436_v0 = vmul.f32 %v1598_v52, %v1596_v56  ;;  %v3218_v56 = vld [vmem:[#allocation15_spill] sm:$0xff]  ;;  %v3219_v52 = vmov 0.0  }
 0x218   :  { %1535 = vst [vmem:[%s3091_s2 + $0x8] sm:$0xff] %v436_v0  ;;  %512 = vmatmul.mubr.f32.vlgmr.msra.gmra.mxu0 %v436_v0  ;;  %583 = vmatmul.mubr.f32.vlgmr.msra.gmra.mxu1 %v436_v0  ;;  %v3220_v0 = vld [vmem:[#allocation21_spill] sm:$0xff] }
 0x219   :  { %629 = vmatpush1.msra.mxu0 %v1783_v1  ;;  %700 = vmatpush1.msra.mxu1 %v1837_v11 }
 0x21a   :  { %630 = vmatprep.subr.mxu0 %v1788_v2  ;;  %701 = vmatprep.subr.mxu1 %v1849_v13 }
 0x21b   :  { %631 = vmatpush1.msra.mxu0 %v1796_v4  ;;  %702 = vmatpush1.msra.mxu1 %v1854_v14 }
 0x21c   :  { %632 = vmatprep.subr.mxu0 %v1802_v5  ;;  %703 = vmatprep.subr.mxu1 %v1866_v16 }
 0x21d   :  { %633 = vmatpush1.msra.mxu0 %v1808_v6  ;;  %704 = vmatpush1.msra.mxu1 %v1878_v18 }
 0x21e   :  { %634 = vmatprep.subr.mxu0 %v1814_v7  ;;  %705 = vmatprep.subr.mxu1 %v1883_v19 }
 0x21f   :  { %635 = vmatpush1.msra.mxu0 %v1820_v8  ;;  %706 = vmatpush1.msra.mxu1 %v1895_v21 }
 0x220   :  { %636 = vmatprep.subr.mxu0 %v1831_v10  ;;  %707 = vmatprep.subr.mxu1 %v1907_v23 }
 0x221   :  { %637 = vmatpush1.msra.mxu0 %v1843_v12  ;;  %708 = vmatpush1.msra.mxu1 %v1919_v25 }
 0x222   :  { %638 = vmatprep.subr.mxu0 %v1860_v15  ;;  %709 = vmatprep.subr.mxu1 %v1931_v27 }
 0x223   :  { %639 = vmatpush1.msra.mxu0 %v1872_v17  ;;  %710 = vmatpush1.msra.mxu1 %v1943_v29 }
 0x224   :  { %640 = vmatprep.subr.mxu0 %v1889_v20  ;;  %711 = vmatprep.subr.mxu1 %v1955_v31 }
 0x225   :  { %641 = vmatpush1.msra.mxu0 %v1901_v22  ;;  %712 = vmatpush1.msra.mxu1 %v1967_v33 }
 0x226   :  { %642 = vmatprep.subr.mxu0 %v1913_v24  ;;  %713 = vmatprep.subr.mxu1 %v1979_v35 }
 0x227   :  { %643 = vmatpush1.msra.mxu0 %v1925_v26  ;;  %714 = vmatpush1.msra.mxu1 %v1991_v37 }
 0x228   :  { %644 = vmatprep.subr.mxu0 %v1937_v28  ;;  %715 = vmatprep.subr.mxu1 %v2003_v39 }
 0x229   :  { %645 = vmatpush1.msra.mxu0 %v1949_v30  ;;  %716 = vmatpush1.msra.mxu1 %v2015_v41 }
 0x22a   :  { %646 = vmatprep.subr.mxu0 %v1961_v32  ;;  %717 = vmatprep.subr.mxu1 %v2027_v43 }
 0x22b   :  { %647 = vmatpush1.msra.mxu0 %v1973_v34  ;;  %718 = vmatpush1.msra.mxu1 %v2039_v45 }
 0x22c   :  { %648 = vmatprep.subr.mxu0 %v1985_v36  ;;  %719 = vmatprep.subr.mxu1 %v2051_v47 }
 0x22d   :  { %649 = vmatpush1.msra.mxu0 %v1997_v38  ;;  %720 = vmatpush1.msra.mxu1 %v2063_v49 }
 0x22e   :  { %650 = vmatprep.subr.mxu0 %v2009_v40  ;;  %721 = vmatprep.subr.mxu1 %v2075_v51 }
 0x22f   :  { %651 = vmatpush1.msra.mxu0 %v2021_v42  ;;  %722 = vmatpush1.msra.mxu1 %v2087_v53 }
 0x230   :  { %652 = vmatprep.subr.mxu0 %v3204_v55  ;;  %723 = vmatprep.subr.mxu1 %v3205_v46 }
 0x231   :  { %653 = vmatpush1.msra.mxu0 %v3206_v9  ;;  %724 = vmatpush1.msra.mxu1 %v3207_v57 }
 0x232   :  { %654 = vmatprep.subr.mxu0 %v3208_v50  ;;  %725 = vmatprep.subr.mxu1 %v3209_v63 }
 0x233   :  { %655 = vmatpush1.msra.mxu0 %v3210_v61  ;;  %726 = vmatpush1.msra.mxu1 %v3211_v59  ;;  %v3221_v59 = vld [vmem:[#allocation4_spill] sm:$0xff] }
 0x234   :  { %656 = vmatprep.subr.mxu0 %v3212_v58  ;;  %727 = vmatprep.subr.mxu1 %v3213_v54  ;;  %v3222_v58 = vld [vmem:[#allocation5_spill] sm:$0xff] }
 0x235   :  { %657 = vmatpush1.msra.mxu0 %v3214_v48  ;;  %728 = vmatpush1.msra.mxu1 %v3215_v3  ;;  %v1536_v3 = vld [vmem:[%s3090_s0 + $0x40] sm:$0xff] }
 0x236   :  { %658 = vmatprep.subr.mxu0 %v3216_v62  ;;  %729 = vmatprep.subr.mxu1 %v3217_v60  ;;  %v1537_v60 = vld [vmem:[%s3090_s0 + $0x48] sm:$0xff] }
 0x237   :  { %659 = vmatpush1.msra.mxu0 %v3218_v56  ;;  %692 = vmatprep.mubr.f32.mxu0 %v3219_v52 }
 0x238   :  { %730 = vmatpush1.msra.mxu1 %v3220_v0  ;;  %763 = vmatprep.mubr.f32.mxu1 %v3219_v52 }
 0x239   :  { %809 = vmatprep.subr.mxu0 %v3221_v59  ;;  %880 = vmatprep.subr.mxu1 %v3222_v58  ;;  %v1539_v58 = vld [vmem:[%s3090_s0 + $0x58] sm:$0xff] }
 0x2d8   :  { %v513_v48 = vpop.f32.mrf.mxu0  ;;  %v584_v61 = vpop.f32.mrf.mxu1 }
 0x2d9   :  { %v589_v56 = vadd.f32 %v1536_v3, %v513_v48  ;;  %v1538_v48 = vld [vmem:[%s3090_s0 + $0x50] sm:$0xff] }
 0x2da   :  { %v515_v62 = vpop.f32.mrf.mxu0  ;;  %v586_v50 = vpop.f32.mrf.mxu1  ;;  %v591_v46 = vadd.f32 %v1538_v48, %v584_v61 }
 0x2db   :  { %v593_v54 = vsub.f32 0.0, %v589_v56  ;;  %v590_v0 = vadd.f32 %v1537_v60, %v515_v62  ;;  %v592_v57 = vadd.f32 %v1539_v58, %v586_v50 }
 0x2dd   :  { %v594_v63 = vmul.f32 1.442695, %v593_v54  ;;  %v599_v52 = vsub.f32 0.0, %v590_v0  ;;  %v606_v9 = vsub.f32 0.0, %v592_v57 }
 0x2df   :  { %1599 = vpow2.f32 %v594_v63  ;;  %v600_v59 = vmul.f32 1.442695, %v599_v52  ;;  %v607_v3 = vmul.f32 1.442695, %v606_v9 }
 0x2e1   :  { %1601 = vpow2.f32 %v600_v59 }
 0x2e2   :  { %1603 = vpow2.f32 %v607_v3 }
 0x2ec   :  { %v1600_v56 = vpop.eup %1599 }
 0x2ed   :  { %v596_v62 = vadd.f32 1.0, %v1600_v56 }
 0x2ee   :  { %v1602_v54 = vpop.eup %1601 }
 0x2ef   :  { %1605 = vrcp.f32 %v596_v62  ;;  %v602_v63 = vadd.f32 1.0, %v1602_v54  ;;  %v1604_v60 = vpop.eup %1603 }
 0x2f0   :  { %1607 = vtanh.f32 %v591_v46  ;;  %v609_v50 = vadd.f32 1.0, %v1604_v60  ;;  %v2529_v60 = vld [vmem:[%s3089_s1 + $0x1c8] sm:$0xff] }
 0x2f1   :  { %1609 = vrcp.f32 %v602_v63  ;;  %v2517_v63 = vld [vmem:[%s3089_s1 + $0x1e0] sm:$0xff] }
 0x2f2   :  { %1611 = vrcp.f32 %v609_v50  ;;  %v2553_v50 = vld [vmem:[%s3089_s1 + $0x1a8] sm:$0xff] }
 0x2fc   :  { %v1606_v52 = vpop.eup %1605 }
 0x2fd   :  { %v1608_v0 = vpop.eup %1607 }
 0x2fe   :  { %v1610_v59 = vpop.eup %1609  ;;  %v614_v57 = vmul.f32 %v1608_v0, %v1606_v52  ;;  %v2535_v52 = vld [vmem:[%s3089_s1 + $0x1d8] sm:$0xff]  ;;  %v2541_v0 = vld [vmem:[%s3089_s1 + $0x1c0] sm:$0xff] }
 0x2ff   :  { %v613_v58 = vmul.f32 %v1610_v59, %v2328_v44  ;;  %v1612_v9 = vpop.eup %1611  ;;  %v2547_v59 = vld [vmem:[%s3089_s1 + $0x1d0] sm:$0xff] }
 0x301   :  { %v2413_v55 = vadd.f32 %v614_v57, %v613_v58  ;;  %v2559_v57 = vld [vmem:[%s3089_s1 + $0x1b8] sm:$0xff]  ;;  %v2565_v58 = vld [vmem:[%s3089_s1 + $0x1a0] sm:$0xff] }
 0x303   :  { %1613 = vtanh.f32 %v2413_v55 }
 0x310   :  { %v1614_v61 = vpop.eup %1613 }
 0x311   :  { %v617_v48 = vmul.f32 %v1614_v61, %v1612_v9  ;;  %v2571_v9 = vld [vmem:[%s3089_s1 + $0x1b0] sm:$0xff]  ;;  %v2577_v61 = vld [vmem:[%s3089_s1 + $0x188] sm:$0xff] }
 0x313   :  { %1540 = vst [vmem:[%s3091_s2 + $0x10] sm:$0xff] %v617_v48  ;;  %693 = vmatmul.mubr.f32.vlgmr.msra.gmra.mxu0 %v617_v48  ;;  %764 = vmatmul.mubr.f32.vlgmr.msra.gmra.mxu1 %v617_v48  ;;  %v2583_v48 = vld [vmem:[%s3089_s1 + $0x198] sm:$0xff] }
 0x314   :  { %810 = vmatpush1.msra.mxu0 %v1783_v1  ;;  %881 = vmatpush1.msra.mxu1 %v1837_v11  ;;  %v3223_v1 = vld [vmem:[#allocation6_spill] sm:$0xff] }
 0x315   :  { %811 = vmatprep.subr.mxu0 %v1788_v2  ;;  %882 = vmatprep.subr.mxu1 %v1849_v13  ;;  %v3224_v2 = vld [vmem:[#allocation12_spill] sm:$0xff]  ;;  %v3231_v11 = vld [vmem:[#allocation10_spill] sm:$0xff]  ;;  %v3233_v13 = vld [vmem:[#allocation11_spill] sm:$0xff] }
 0x316   :  { %812 = vmatpush1.msra.mxu0 %v1796_v4  ;;  %883 = vmatpush1.msra.mxu1 %v1854_v14  ;;  %v3225_v4 = vld [vmem:[#allocation7_spill] sm:$0xff] }
 0x317   :  { %813 = vmatprep.subr.mxu0 %v1802_v5  ;;  %884 = vmatprep.subr.mxu1 %v1866_v16  ;;  %v3226_v5 = vld [vmem:[#allocation14_spill] sm:$0xff]  ;;  %v3234_v14 = vld [vmem:[#allocation19_spill] sm:$0xff]  ;;  %v3236_v16 = vld [vmem:[#allocation20_spill] sm:$0xff] }
 0x318   :  { %814 = vmatpush1.msra.mxu0 %v1808_v6  ;;  %885 = vmatpush1.msra.mxu1 %v1878_v18  ;;  %v3227_v6 = vld [vmem:[#allocation8_spill] sm:$0xff]  ;;  %v3238_v18 = vmov 0.0  }
 0x319   :  { %815 = vmatprep.subr.mxu0 %v1814_v7  ;;  %886 = vmatprep.subr.mxu1 %v1883_v19  ;;  %v3228_v7 = vld [vmem:[#allocation16_spill] sm:$0xff]  ;;  %v3239_v19 = vld [vmem:[#allocation21_spill] sm:$0xff] }
 0x31a   :  { %816 = vmatpush1.msra.mxu0 %v1820_v8  ;;  %887 = vmatpush1.msra.mxu1 %v1895_v21  ;;  %v3229_v8 = vld [vmem:[#allocation9_spill] sm:$0xff]  ;;  %v2492_v21 = vld [vmem:[%s3089_s1 + $0x1f8] sm:$0xff] }
 0x31b   :  { %817 = vmatprep.subr.mxu0 %v1831_v10  ;;  %888 = vmatprep.subr.mxu1 %v1907_v23  ;;  %v3230_v10 = vld [vmem:[#allocation17_spill] sm:$0xff]  ;;  %3241 = vst [vmem:[#allocation5_spill] sm:$0xff] %v2492_v21 }
 0x31c   :  { %818 = vmatpush1.msra.mxu0 %v1843_v12  ;;  %889 = vmatpush1.msra.mxu1 %v1919_v25  ;;  %v3232_v12 = vld [vmem:[#allocation18_spill] sm:$0xff] }
 0x31d   :  { %819 = vmatprep.subr.mxu0 %v1860_v15  ;;  %890 = vmatprep.subr.mxu1 %v1931_v27  ;;  %v3235_v15 = vld [vmem:[#allocation13_spill] sm:$0xff] }
 0x31e   :  { %820 = vmatpush1.msra.mxu0 %v1872_v17  ;;  %891 = vmatpush1.msra.mxu1 %v1943_v29  ;;  %v3237_v17 = vld [vmem:[#allocation15_spill] sm:$0xff] }
 0x31f   :  { %821 = vmatprep.subr.mxu0 %v1889_v20  ;;  %892 = vmatprep.subr.mxu1 %v1955_v31  ;;  %v2486_v20 = vld [vmem:[%s3089_s1 + $0x1e8] sm:$0xff] }
 0x320   :  { %822 = vmatpush1.msra.mxu0 %v1901_v22  ;;  %893 = vmatpush1.msra.mxu1 %v1967_v33  ;;  %3240 = vst [vmem:[#allocation4_spill] sm:$0xff] %v2486_v20  ;;  %v1541_v22 = vld [vmem:[%s3090_s0 + $0x60] sm:$0xff]  ;;  %v1544_v33 = vld [vmem:[%s3090_s0 + $0x78] sm:$0xff] }
 0x321   :  { %823 = vmatprep.subr.mxu0 %v1913_v24  ;;  %894 = vmatprep.subr.mxu1 %v1979_v35  ;;  %v1542_v24 = vld [vmem:[%s3090_s0 + $0x68] sm:$0xff] }
 0x322   :  { %824 = vmatpush1.msra.mxu0 %v1925_v26  ;;  %895 = vmatpush1.msra.mxu1 %v1991_v37  ;;  %v1543_v37 = vld [vmem:[%s3090_s0 + $0x70] sm:$0xff] }
 0x323   :  { %825 = vmatprep.subr.mxu0 %v1937_v28  ;;  %896 = vmatprep.subr.mxu1 %v2003_v39 }
 0x324   :  { %826 = vmatpush1.msra.mxu0 %v1949_v30  ;;  %897 = vmatpush1.msra.mxu1 %v2015_v41 }
 0x325   :  { %827 = vmatprep.subr.mxu0 %v1961_v32  ;;  %898 = vmatprep.subr.mxu1 %v2027_v43 }
 0x326   :  { %828 = vmatpush1.msra.mxu0 %v1973_v34  ;;  %899 = vmatpush1.msra.mxu1 %v2039_v45 }
 0x327   :  { %829 = vmatprep.subr.mxu0 %v1985_v36  ;;  %900 = vmatprep.subr.mxu1 %v2051_v47 }
 0x328   :  { %830 = vmatpush1.msra.mxu0 %v1997_v38  ;;  %901 = vmatpush1.msra.mxu1 %v2063_v49 }
 0x329   :  { %831 = vmatprep.subr.mxu0 %v2009_v40  ;;  %902 = vmatprep.subr.mxu1 %v2075_v51 }
 0x32a   :  { %832 = vmatpush1.msra.mxu0 %v2021_v42  ;;  %903 = vmatpush1.msra.mxu1 %v2087_v53 }
 0x32b   :  { %833 = vmatprep.subr.mxu0 %v3223_v1  ;;  %904 = vmatprep.subr.mxu1 %v3224_v2  ;;  %v2589_v1 = vld [vmem:[%s3089_s1 + $0x180] sm:$0xff]  ;;  %v2595_v2 = vld [vmem:[%s3089_s1 + $0x190] sm:$0xff] }
 0x32c   :  { %834 = vmatpush1.msra.mxu0 %v3225_v4  ;;  %905 = vmatpush1.msra.mxu1 %v3226_v5  ;;  %v2601_v4 = vld [vmem:[%s3089_s1 + $0x168] sm:$0xff]  ;;  %v2607_v5 = vld [vmem:[%s3089_s1 + $0x178] sm:$0xff] }
 0x32d   :  { %835 = vmatprep.subr.mxu0 %v3227_v6  ;;  %906 = vmatprep.subr.mxu1 %v3228_v7  ;;  %v2613_v6 = vld [vmem:[%s3089_s1 + $0x160] sm:$0xff]  ;;  %v2619_v7 = vld [vmem:[%s3089_s1 + $0x170] sm:$0xff] }
 0x32e   :  { %836 = vmatpush1.msra.mxu0 %v3229_v8  ;;  %907 = vmatpush1.msra.mxu1 %v3230_v10  ;;  %v2625_v8 = vld [vmem:[%s3089_s1 + $0x148] sm:$0xff]  ;;  %v2631_v10 = vld [vmem:[%s3089_s1 + $0x158] sm:$0xff] }
 0x32f   :  { %837 = vmatprep.subr.mxu0 %v3231_v11  ;;  %908 = vmatprep.subr.mxu1 %v3232_v12  ;;  %v2637_v11 = vld [vmem:[%s3089_s1 + $0x140] sm:$0xff]  ;;  %v2643_v12 = vld [vmem:[%s3089_s1 + $0x150] sm:$0xff] }
 0x330   :  { %838 = vmatpush1.msra.mxu0 %v3233_v13  ;;  %909 = vmatpush1.msra.mxu1 %v3234_v14  ;;  %v2649_v13 = vld [vmem:[%s3089_s1 + $0x128] sm:$0xff] }
 0x331   :  { %839 = vmatprep.subr.mxu0 %v3235_v15  ;;  %910 = vmatprep.subr.mxu1 %v3236_v16  ;;  %v2655_v15 = vld [vmem:[%s3089_s1 + $0x138] sm:$0xff] }
 0x332   :  { %840 = vmatpush1.msra.mxu0 %v3237_v17  ;;  %873 = vmatprep.mubr.f32.mxu0 %v3238_v18  ;;  %v2661_v17 = vld [vmem:[%s3089_s1 + $0x120] sm:$0xff] }
 0x333   :  { %911 = vmatpush1.msra.mxu1 %v3239_v19  ;;  %944 = vmatprep.mubr.f32.mxu1 %v3238_v18 }
 0x334   :  { %990 = vmatprep.subr.mxu0 %v2486_v20  ;;  %1061 = vmatprep.subr.mxu1 %v2492_v21 }
 0x3d3   :  { %v694_v23 = vpop.f32.mrf.mxu0  ;;  %v765_v28 = vpop.f32.mrf.mxu1 }
 0x3d4   :  { %v770_v25 = vadd.f32 %v1541_v22, %v694_v23  ;;  %v772_v40 = vadd.f32 %v1543_v37, %v765_v28  ;;  %v2667_v22 = vld [vmem:[%s3089_s1 + $0x130] sm:$0xff]  ;;  %v2673_v23 = vld [vmem:[%s3089_s1 + $0x108] sm:$0xff]  ;;  %v2703_v28 = vld [vmem:[%s3089_s1 + $0xf8] sm:$0xff] }
 0x3d5   :  { %v696_v26 = vpop.f32.mrf.mxu0  ;;  %v767_v34 = vpop.f32.mrf.mxu1  ;;  %v2757_v37 = vld [vmem:[%s3089_s1 + $0xa0] sm:$0xff] }
 0x3d6   :  { %v774_v27 = vsub.f32 0.0, %v770_v25  ;;  %v771_v29 = vadd.f32 %v1542_v24, %v696_v26  ;;  %v773_v35 = vadd.f32 %v1544_v33, %v767_v34  ;;  %v2679_v24 = vld [vmem:[%s3089_s1 + $0x118] sm:$0xff]  ;;  %v2685_v25 = vld [vmem:[%s3089_s1 + $0x100] sm:$0xff]  ;;  %v2691_v26 = vld [vmem:[%s3089_s1 + $0x110] sm:$0xff] }
 0x3d7   :  { %v2733_v33 = vld [vmem:[%s3089_s1 + $0xc0] sm:$0xff]  ;;  %v2739_v34 = vld [vmem:[%s3089_s1 + $0xd0] sm:$0xff] }
 0x3d8   :  { %v775_v30 = vmul.f32 1.442695, %v774_v27  ;;  %v780_v31 = vsub.f32 0.0, %v771_v29  ;;  %v787_v36 = vsub.f32 0.0, %v773_v35  ;;  %v2697_v27 = vld [vmem:[%s3089_s1 + $0xe8] sm:$0xff]  ;;  %v2709_v29 = vld [vmem:[%s3089_s1 + $0xe0] sm:$0xff] }
 0x3d9   :  { %v2745_v35 = vld [vmem:[%s3089_s1 + $0xa8] sm:$0xff] }
 0x3da   :  { %1615 = vpow2.f32 %v775_v30  ;;  %v781_v32 = vmul.f32 1.442695, %v780_v31  ;;  %v788_v38 = vmul.f32 1.442695, %v787_v36  ;;  %v2715_v30 = vld [vmem:[%s3089_s1 + $0xf0] sm:$0xff]  ;;  %v2721_v31 = vld [vmem:[%s3089_s1 + $0xc8] sm:$0xff] }
 0x3db   :  { %v2751_v36 = vld [vmem:[%s3089_s1 + $0xb8] sm:$0xff] }
 0x3dc   :  { %1617 = vpow2.f32 %v781_v32  ;;  %v2727_v32 = vld [vmem:[%s3089_s1 + $0xd8] sm:$0xff] }
 0x3dd   :  { %1619 = vpow2.f32 %v788_v38  ;;  %v2763_v38 = vld [vmem:[%s3089_s1 + $0xb0] sm:$0xff] }
 0x3e7   :  { %v1616_v39 = vpop.eup %1615 }
 0x3e8   :  { %v777_v41 = vadd.f32 1.0, %v1616_v39  ;;  %v2769_v39 = vld [vmem:[%s3089_s1 + $0x88] sm:$0xff] }
 0x3e9   :  { %v1618_v42 = vpop.eup %1617 }
 0x3ea   :  { %1621 = vrcp.f32 %v777_v41  ;;  %v783_v43 = vadd.f32 1.0, %v1618_v42  ;;  %v1620_v44 = vpop.eup %1619  ;;  %v2781_v41 = vld [vmem:[%s3089_s1 + $0x80] sm:$0xff]  ;;  %v2787_v42 = vld [vmem:[%s3089_s1 + $0x90] sm:$0xff] }
 0x3eb   :  { %1623 = vtanh.f32 %v772_v40  ;;  %v790_v51 = vadd.f32 1.0, %v1620_v44  ;;  %v2775_v40 = vld [vmem:[%s3089_s1 + $0x98] sm:$0xff] }
 0x3ec   :  { %1625 = vrcp.f32 %v783_v43  ;;  %v2793_v43 = vld [vmem:[%s3089_s1 + $0x68] sm:$0xff]  ;;  %v2799_v44 = vld [vmem:[%s3089_s1 + $0x78] sm:$0xff] }
 0x3ed   :  { %1627 = vrcp.f32 %v790_v51  ;;  %3242 = vst [vmem:[#allocation6_spill] sm:$0xff] %v2793_v43  ;;  %3243 = vst [vmem:[#allocation12_spill] sm:$0xff] %v2799_v44  ;;  %v2823_v51 = vld [vmem:[%s3089_s1 + $0x58] sm:$0xff] }
 0x3ee   :  { %3247 = vst [vmem:[#allocation16_spill] sm:$0xff] %v2823_v51 }
 0x3f7   :  { %v1622_v45 = vpop.eup %1621 }
 0x3f8   :  { %v1624_v47 = vpop.eup %1623 }
 0x3f9   :  { %v1626_v49 = vpop.eup %1625  ;;  %v795_v53 = vmul.f32 %v1624_v47, %v1622_v45  ;;  %v2805_v45 = vld [vmem:[%s3089_s1 + $0x60] sm:$0xff]  ;;  %v2811_v47 = vld [vmem:[%s3089_s1 + $0x70] sm:$0xff] }
 0x3fa   :  { %v794_v46 = vmul.f32 %v1626_v49, %v2413_v55  ;;  %v1628_v56 = vpop.eup %1627  ;;  %v2523_v55 = vld [vmem:[%s3089_s1 + $0x1f0] sm:$0xff]  ;;  %3244 = vst [vmem:[#allocation7_spill] sm:$0xff] %v2805_v45  ;;  %3245 = vst [vmem:[#allocation14_spill] sm:$0xff] %v2811_v47  ;;  %v2817_v49 = vld [vmem:[%s3089_s1 + $0x48] sm:$0xff] }
 0x3fb   :  { %3246 = vst [vmem:[#allocation8_spill] sm:$0xff] %v2817_v49 }
 0x3fc   :  { %v2508_v3 = vadd.f32 %v795_v53, %v794_v46  ;;  %v2829_v53 = vld [vmem:[%s3089_s1 + $0x40] sm:$0xff]  ;;  %v2835_v46 = vld [vmem:[%s3089_s1 + $0x50] sm:$0xff] }
 0x3fd   :  { %3248 = vst [vmem:[#allocation9_spill] sm:$0xff] %v2829_v53  ;;  %3249 = vst [vmem:[#allocation17_spill] sm:$0xff] %v2835_v46 }
 0x3fe   :  { %1629 = vtanh.f32 %v2508_v3 }
 0x40b   :  { %v1630_v62 = vpop.eup %1629 }
 0x40c   :  { %v798_v54 = vmul.f32 %v1630_v62, %v1628_v56  ;;  %v2841_v56 = vld [vmem:[%s3089_s1 + $0x28] sm:$0xff]  ;;  %v2847_v62 = vld [vmem:[%s3089_s1 + $0x38] sm:$0xff] }
 0x40d   :  { %3250 = vst [vmem:[#allocation10_spill] sm:$0xff] %v2841_v56  ;;  %3251 = vst [vmem:[#allocation18_spill] sm:$0xff] %v2847_v62 }
 0x40e   :  { %1545 = vst [vmem:[%s3091_s2 + $0x18] sm:$0xff] %v798_v54  ;;  %874 = vmatmul.mubr.f32.vlgmr.msra.gmra.mxu0 %v798_v54  ;;  %945 = vmatmul.mubr.f32.vlgmr.msra.gmra.mxu1 %v798_v54  ;;  %v2853_v54 = vld [vmem:[%s3089_s1 + $0x20] sm:$0xff] }
 0x40f   :  { %991 = vmatpush1.msra.mxu0 %v2517_v63  ;;  %1062 = vmatpush1.msra.mxu1 %v2523_v55  ;;  %3252 = vst [vmem:[#allocation11_spill] sm:$0xff] %v2853_v54 }
 0x410   :  { %992 = vmatprep.subr.mxu0 %v2529_v60  ;;  %1063 = vmatprep.subr.mxu1 %v2535_v52 }
 0x411   :  { %993 = vmatpush1.msra.mxu0 %v2541_v0  ;;  %1064 = vmatpush1.msra.mxu1 %v2547_v59 }
 0x412   :  { %994 = vmatprep.subr.mxu0 %v2553_v50  ;;  %1065 = vmatprep.subr.mxu1 %v2559_v57 }
 0x413   :  { %995 = vmatpush1.msra.mxu0 %v2565_v58  ;;  %1066 = vmatpush1.msra.mxu1 %v2571_v9 }
 0x414   :  { %996 = vmatprep.subr.mxu0 %v2577_v61  ;;  %1067 = vmatprep.subr.mxu1 %v2583_v48 }
 0x415   :  { %997 = vmatpush1.msra.mxu0 %v2589_v1  ;;  %1068 = vmatpush1.msra.mxu1 %v2595_v2 }
 0x416   :  { %998 = vmatprep.subr.mxu0 %v2601_v4  ;;  %1069 = vmatprep.subr.mxu1 %v2607_v5 }
 0x417   :  { %999 = vmatpush1.msra.mxu0 %v2613_v6  ;;  %1070 = vmatpush1.msra.mxu1 %v2619_v7 }
 0x418   :  { %1000 = vmatprep.subr.mxu0 %v2625_v8  ;;  %1071 = vmatprep.subr.mxu1 %v2631_v10 }
 0x419   :  { %1001 = vmatpush1.msra.mxu0 %v2637_v11  ;;  %1072 = vmatpush1.msra.mxu1 %v2643_v12 }
 0x41a   :  { %1002 = vmatprep.subr.mxu0 %v2649_v13  ;;  %1073 = vmatprep.subr.mxu1 %v2655_v15 }
 0x41b   :  { %1003 = vmatpush1.msra.mxu0 %v2661_v17  ;;  %1074 = vmatpush1.msra.mxu1 %v2667_v22 }
 0x41c   :  { %1004 = vmatprep.subr.mxu0 %v2673_v23  ;;  %1075 = vmatprep.subr.mxu1 %v2679_v24 }
 0x41d   :  { %1005 = vmatpush1.msra.mxu0 %v2685_v25  ;;  %1076 = vmatpush1.msra.mxu1 %v2691_v26 }
 0x41e   :  { %1006 = vmatprep.subr.mxu0 %v2697_v27  ;;  %1077 = vmatprep.subr.mxu1 %v2703_v28 }
 0x41f   :  { %1007 = vmatpush1.msra.mxu0 %v2709_v29  ;;  %1078 = vmatpush1.msra.mxu1 %v2715_v30 }
 0x420   :  { %1008 = vmatprep.subr.mxu0 %v2721_v31  ;;  %1079 = vmatprep.subr.mxu1 %v2727_v32 }
 0x421   :  { %1009 = vmatpush1.msra.mxu0 %v2733_v33  ;;  %1080 = vmatpush1.msra.mxu1 %v2739_v34 }
 0x422   :  { %1010 = vmatprep.subr.mxu0 %v2745_v35  ;;  %1081 = vmatprep.subr.mxu1 %v2751_v36 }
 0x423   :  { %1011 = vmatpush1.msra.mxu0 %v2757_v37  ;;  %1082 = vmatpush1.msra.mxu1 %v2763_v38 }
 0x424   :  { %1012 = vmatprep.subr.mxu0 %v2769_v39  ;;  %1083 = vmatprep.subr.mxu1 %v2775_v40 }
 0x425   :  { %1013 = vmatpush1.msra.mxu0 %v2781_v41  ;;  %1084 = vmatpush1.msra.mxu1 %v2787_v42 }
 0x426   :  { %1014 = vmatprep.subr.mxu0 %v2793_v43  ;;  %1085 = vmatprep.subr.mxu1 %v2799_v44 }
 0x427   :  { %1015 = vmatpush1.msra.mxu0 %v2805_v45  ;;  %1086 = vmatpush1.msra.mxu1 %v2811_v47 }
 0x428   :  { %1016 = vmatprep.subr.mxu0 %v2817_v49  ;;  %1087 = vmatprep.subr.mxu1 %v2823_v51 }
 0x429   :  { %1017 = vmatpush1.msra.mxu0 %v2829_v53  ;;  %1088 = vmatpush1.msra.mxu1 %v2835_v46 }
 0x42a   :  { %1018 = vmatprep.subr.mxu0 %v2841_v56  ;;  %1089 = vmatprep.subr.mxu1 %v2847_v62  ;;  %v2860_v56 = vld [vmem:[%s3089_s1 + $0x8] sm:$0xff]  ;;  %v2867_v62 = vld [vmem:[%s3089_s1] sm:$0xff] }
 0x42b   :  { %1019 = vmatpush1.msra.mxu0 %v2853_v54  ;;  %1090 = vmatpush1.msra.mxu1 %v3234_v14  ;;  %3253 = vst [vmem:[#allocation19_spill] sm:$0xff] %v2860_v56  ;;  %3254 = vst [vmem:[#allocation13_spill] sm:$0xff] %v2867_v62  ;;  %v1546_v14 = vld [vmem:[%s3090_s0 + $0x80] sm:$0xff] }
 0x42c   :  { %1020 = vmatprep.subr.mxu0 %v2860_v56  ;;  %1091 = vmatprep.subr.mxu1 %v3236_v16  ;;  %v1547_v56 = vld [vmem:[%s3090_s0 + $0x88] sm:$0xff] }
 0x42d   :  { %1021 = vmatpush1.msra.mxu0 %v2867_v62  ;;  %1054 = vmatprep.mubr.f32.mxu0 %v3238_v18 }
 0x42e   :  { %1092 = vmatpush1.msra.mxu1 %v3239_v19  ;;  %1125 = vmatprep.mubr.f32.mxu1 %v3238_v18 }
 0x42f   :  { %1171 = vmatprep.subr.mxu0 %v2486_v20  ;;  %1242 = vmatprep.subr.mxu1 %v2492_v21  ;;  %v1549_v21 = vld [vmem:[%s3090_s0 + $0x98] sm:$0xff] }
 0x4ce   :  { %v875_v16 = vpop.f32.mrf.mxu0  ;;  %v946_v53 = vpop.f32.mrf.mxu1 }
 0x4cf   :  { %v951_v62 = vadd.f32 %v1546_v14, %v875_v16  ;;  %v1548_v14 = vld [vmem:[%s3090_s0 + $0x90] sm:$0xff] }
 0x4d0   :  { %v877_v54 = vpop.f32.mrf.mxu0  ;;  %v948_v49 = vpop.f32.mrf.mxu1  ;;  %v953_v44 = vadd.f32 %v1548_v14, %v946_v53 }
 0x4d1   :  { %v955_v46 = vsub.f32 0.0, %v951_v62  ;;  %v952_v19 = vadd.f32 %v1547_v56, %v877_v54  ;;  %v954_v47 = vadd.f32 %v1549_v21, %v948_v49 }
 0x4d3   :  { %v956_v51 = vmul.f32 1.442695, %v955_v46  ;;  %v961_v18 = vsub.f32 0.0, %v952_v19  ;;  %v968_v45 = vsub.f32 0.0, %v954_v47 }
 0x4d5   :  { %1631 = vpow2.f32 %v956_v51  ;;  %v962_v20 = vmul.f32 1.442695, %v961_v18  ;;  %v969_v16 = vmul.f32 1.442695, %v968_v45 }
 0x4d7   :  { %1633 = vpow2.f32 %v962_v20 }
 0x4d8   :  { %1635 = vpow2.f32 %v969_v16  ;;  %v3257_v16 = vld [vmem:[#allocation7_spill] sm:$0xff] }
 0x4e2   :  { %v1632_v62 = vpop.eup %1631 }
 0x4e3   :  { %v958_v56 = vadd.f32 1.0, %v1632_v62  ;;  %v3258_v62 = vld [vmem:[#allocation14_spill] sm:$0xff] }
 0x4e4   :  { %v1634_v46 = vpop.eup %1633 }
 0x4e5   :  { %1637 = vrcp.f32 %v958_v56  ;;  %v964_v18 = vadd.f32 1.0, %v1634_v46  ;;  %v1636_v51 = vpop.eup %1635  ;;  %v3259_v56 = vld [vmem:[#allocation8_spill] sm:$0xff] }
 0x4e6   :  { %1639 = vtanh.f32 %v953_v44  ;;  %v971_v21 = vadd.f32 1.0, %v1636_v51  ;;  %v3256_v44 = vld [vmem:[#allocation12_spill] sm:$0xff]  ;;  %v3262_v51 = vld [vmem:[#allocation17_spill] sm:$0xff] }
 0x4e7   :  { %1641 = vrcp.f32 %v964_v18  ;;  %v3260_v46 = vld [vmem:[#allocation16_spill] sm:$0xff]  ;;  %v3261_v18 = vld [vmem:[#allocation9_spill] sm:$0xff] }
 0x4e8   :  { %1643 = vrcp.f32 %v971_v21  ;;  %v2954_v21 = vld [vmem:[%s3089_s1 + $0x30] sm:$0xff] }
 0x4e9   :  { %3266 = vst [vmem:[#allocation20_spill] sm:$0xff] %v2954_v21 }
 0x4f2   :  { %v1638_v54 = vpop.eup %1637 }
 0x4f3   :  { %v1640_v19 = vpop.eup %1639 }
 0x4f4   :  { %v1642_v20 = vpop.eup %1641  ;;  %v976_v47 = vmul.f32 %v1640_v19, %v1638_v54  ;;  %v3263_v54 = vld [vmem:[#allocation10_spill] sm:$0xff] }
 0x4f5   :  { %v975_v49 = vmul.f32 %v1642_v20, %v2508_v3  ;;  %v1644_v45 = vpop.eup %1643  ;;  %v3255_v3 = vld [vmem:[#allocation6_spill] sm:$0xff]  ;;  %v3265_v20 = vld [vmem:[#allocation11_spill] sm:$0xff] }
 0x4f6   :  { %v3264_v19 = vld [vmem:[#allocation18_spill] sm:$0xff] }
 0x4f7   :  { %v2888_v43 = vadd.f32 %v976_v47, %v975_v49  ;;  %v3267_v47 = vld [vmem:[#allocation19_spill] sm:$0xff] }
 0x4f8   :  { %v2961_v49 = vld [vmem:[%s3089_s1 + $0x18] sm:$0xff] }
 0x4f9   :  { %1645 = vtanh.f32 %v2888_v43  ;;  %3268 = vst [vmem:[#allocation15_spill] sm:$0xff] %v2961_v49 }
 0x506   :  { %v1646_v53 = vpop.eup %1645 }
 0x507   :  { %v979_v14 = vmul.f32 %v1646_v53, %v1644_v45  ;;  %v3269_v45 = vld [vmem:[#allocation13_spill] sm:$0xff]  ;;  %v3270_v53 = vmov 0.0  }
 0x509   :  { %1550 = vst [vmem:[%s3091_s2 + $0x20] sm:$0xff] %v979_v14  ;;  %1055 = vmatmul.mubr.f32.vlgmr.msra.gmra.mxu0 %v979_v14  ;;  %1126 = vmatmul.mubr.f32.vlgmr.msra.gmra.mxu1 %v979_v14  ;;  %v2969_v14 = vld [vmem:[%s3089_s1 + $0x10] sm:$0xff] }
 0x50a   :  { %1172 = vmatpush1.msra.mxu0 %v2517_v63  ;;  %1243 = vmatpush1.msra.mxu1 %v2523_v55  ;;  %3271 = vst [vmem:[#allocation21_spill] sm:$0xff] %v2969_v14 }
 0x50b   :  { %1173 = vmatprep.subr.mxu0 %v2529_v60  ;;  %1244 = vmatprep.subr.mxu1 %v2535_v52 }
 0x50c   :  { %1174 = vmatpush1.msra.mxu0 %v2541_v0  ;;  %1245 = vmatpush1.msra.mxu1 %v2547_v59 }
 0x50d   :  { %1175 = vmatprep.subr.mxu0 %v2553_v50  ;;  %1246 = vmatprep.subr.mxu1 %v2559_v57 }
 0x50e   :  { %1176 = vmatpush1.msra.mxu0 %v2565_v58  ;;  %1247 = vmatpush1.msra.mxu1 %v2571_v9 }
 0x50f   :  { %1177 = vmatprep.subr.mxu0 %v2577_v61  ;;  %1248 = vmatprep.subr.mxu1 %v2583_v48 }
 0x510   :  { %1178 = vmatpush1.msra.mxu0 %v2589_v1  ;;  %1249 = vmatpush1.msra.mxu1 %v2595_v2 }
 0x511   :  { %1179 = vmatprep.subr.mxu0 %v2601_v4  ;;  %1250 = vmatprep.subr.mxu1 %v2607_v5 }
 0x512   :  { %1180 = vmatpush1.msra.mxu0 %v2613_v6  ;;  %1251 = vmatpush1.msra.mxu1 %v2619_v7 }
 0x513   :  { %1181 = vmatprep.subr.mxu0 %v2625_v8  ;;  %1252 = vmatprep.subr.mxu1 %v2631_v10 }
 0x514   :  { %1182 = vmatpush1.msra.mxu0 %v2637_v11  ;;  %1253 = vmatpush1.msra.mxu1 %v2643_v12 }
 0x515   :  { %1183 = vmatprep.subr.mxu0 %v2649_v13  ;;  %1254 = vmatprep.subr.mxu1 %v2655_v15 }
 0x516   :  { %1184 = vmatpush1.msra.mxu0 %v2661_v17  ;;  %1255 = vmatpush1.msra.mxu1 %v2667_v22 }
 0x517   :  { %1185 = vmatprep.subr.mxu0 %v2673_v23  ;;  %1256 = vmatprep.subr.mxu1 %v2679_v24 }
 0x518   :  { %1186 = vmatpush1.msra.mxu0 %v2685_v25  ;;  %1257 = vmatpush1.msra.mxu1 %v2691_v26 }
 0x519   :  { %1187 = vmatprep.subr.mxu0 %v2697_v27  ;;  %1258 = vmatprep.subr.mxu1 %v2703_v28 }
 0x51a   :  { %1188 = vmatpush1.msra.mxu0 %v2709_v29  ;;  %1259 = vmatpush1.msra.mxu1 %v2715_v30 }
 0x51b   :  { %1189 = vmatprep.subr.mxu0 %v2721_v31  ;;  %1260 = vmatprep.subr.mxu1 %v2727_v32 }
 0x51c   :  { %1190 = vmatpush1.msra.mxu0 %v2733_v33  ;;  %1261 = vmatpush1.msra.mxu1 %v2739_v34 }
 0x51d   :  { %1191 = vmatprep.subr.mxu0 %v2745_v35  ;;  %1262 = vmatprep.subr.mxu1 %v2751_v36 }
 0x51e   :  { %1192 = vmatpush1.msra.mxu0 %v2757_v37  ;;  %1263 = vmatpush1.msra.mxu1 %v2763_v38 }
 0x51f   :  { %1193 = vmatprep.subr.mxu0 %v2769_v39  ;;  %1264 = vmatprep.subr.mxu1 %v2775_v40 }
 0x520   :  { %1194 = vmatpush1.msra.mxu0 %v2781_v41  ;;  %1265 = vmatpush1.msra.mxu1 %v2787_v42 }
 0x521   :  { %1195 = vmatprep.subr.mxu0 %v3255_v3  ;;  %1266 = vmatprep.subr.mxu1 %v3256_v44 }
 0x522   :  { %1196 = vmatpush1.msra.mxu0 %v3257_v16  ;;  %1267 = vmatpush1.msra.mxu1 %v3258_v62 }
 0x523   :  { %1197 = vmatprep.subr.mxu0 %v3259_v56  ;;  %1268 = vmatprep.subr.mxu1 %v3260_v46 }
 0x524   :  { %1198 = vmatpush1.msra.mxu0 %v3261_v18  ;;  %1269 = vmatpush1.msra.mxu1 %v3262_v51 }
 0x525   :  { %1199 = vmatprep.subr.mxu0 %v3263_v54  ;;  %1270 = vmatprep.subr.mxu1 %v3264_v19 }
 0x526   :  { %1200 = vmatpush1.msra.mxu0 %v3265_v20  ;;  %1271 = vmatpush1.msra.mxu1 %v2954_v21  ;;  %v3273_v21 = vld [vmem:[#allocation5_spill] sm:$0xff] }
 0x527   :  { %1201 = vmatprep.subr.mxu0 %v3267_v47  ;;  %1272 = vmatprep.subr.mxu1 %v2961_v49  ;;  %v3272_v47 = vld [vmem:[#allocation4_spill] sm:$0xff]  ;;  %v1552_v20 = vld [vmem:[%s3090_s0 + $0xa8] sm:$0xff] }
 0x528   :  { %1202 = vmatpush1.msra.mxu0 %v3269_v45  ;;  %1235 = vmatprep.mubr.f32.mxu0 %v3270_v53  ;;  %v1551_v49 = vld [vmem:[%s3090_s0 + $0xa0] sm:$0xff] }
 0x529   :  { %1273 = vmatpush1.msra.mxu1 %v2969_v14  ;;  %1306 = vmatprep.mubr.f32.mxu1 %v3270_v53 }
 0x52a   :  { %1352 = vmatprep.subr.mxu0 %v3272_v47  ;;  %1423 = vmatprep.subr.mxu1 %v3273_v21  ;;  %v1554_v21 = vld [vmem:[%s3090_s0 + $0xb8] sm:$0xff] }
 0x5c9   :  { %v1056_v45 = vpop.f32.mrf.mxu0  ;;  %v1127_v18 = vpop.f32.mrf.mxu1 }
 0x5ca   :  { %v1132_v19 = vadd.f32 %v1551_v49, %v1056_v45  ;;  %v1553_v49 = vld [vmem:[%s3090_s0 + $0xb0] sm:$0xff] }
 0x5cb   :  { %v1058_v54 = vpop.f32.mrf.mxu0  ;;  %v1129_v56 = vpop.f32.mrf.mxu1  ;;  %v1134_v44 = vadd.f32 %v1553_v49, %v1127_v18 }
 0x5cc   :  { %v1136_v51 = vsub.f32 0.0, %v1132_v19  ;;  %v1133_v14 = vadd.f32 %v1552_v20, %v1058_v54  ;;  %v1135_v62 = vadd.f32 %v1554_v21, %v1129_v56 }
 0x5ce   :  { %v1137_v46 = vmul.f32 1.442695, %v1136_v51  ;;  %v1142_v53 = vsub.f32 0.0, %v1133_v14  ;;  %v1149_v16 = vsub.f32 0.0, %v1135_v62 }
 0x5d0   :  { %1647 = vpow2.f32 %v1137_v46  ;;  %v1143_v47 = vmul.f32 1.442695, %v1142_v53  ;;  %v1150_v45 = vmul.f32 1.442695, %v1149_v16 }
 0x5d2   :  { %1649 = vpow2.f32 %v1143_v47 }
 0x5d3   :  { %1651 = vpow2.f32 %v1150_v45 }
 0x5dd   :  { %v1648_v19 = vpop.eup %1647 }
 0x5de   :  { %v1139_v54 = vadd.f32 1.0, %v1648_v19 }
 0x5df   :  { %v1650_v51 = vpop.eup %1649 }
 0x5e0   :  { %1653 = vrcp.f32 %v1139_v54  ;;  %v1145_v46 = vadd.f32 1.0, %v1650_v51  ;;  %v1652_v20 = vpop.eup %1651  ;;  %v1561_v54 = vld [vmem:[%s3090_s0 + $0xe0] sm:$0xff] }
 0x5e1   :  { %1655 = vtanh.f32 %v1134_v44  ;;  %v1152_v56 = vadd.f32 1.0, %v1652_v20 }
 0x5e2   :  { %1657 = vrcp.f32 %v1145_v46 }
 0x5e3   :  { %1659 = vrcp.f32 %v1152_v56 }
 0x5ed   :  { %v1654_v53 = vpop.eup %1653 }
 0x5ee   :  { %v1656_v14 = vpop.eup %1655 }
 0x5ef   :  { %v1658_v47 = vpop.eup %1657  ;;  %v1157_v62 = vmul.f32 %v1656_v14, %v1654_v53 }
 0x5f0   :  { %v1156_v21 = vmul.f32 %v1658_v47, %v2888_v43  ;;  %v1660_v16 = vpop.eup %1659 }
 0x5f2   :  { %v2988_v3 = vadd.f32 %v1157_v62, %v1156_v21 }
 0x5f4   :  { %1661 = vtanh.f32 %v2988_v3 }
 0x601   :  { %v1662_v18 = vpop.eup %1661 }
 0x602   :  { %v1160_v49 = vmul.f32 %v1662_v18, %v1660_v16  ;;  %v1564_v16 = vld [vmem:[%s3090_s0 + $0xf8] sm:$0xff] }
 0x604   :  { %1555 = vst [vmem:[%s3091_s2 + $0x28] sm:$0xff] %v1160_v49  ;;  %1236 = vmatmul.mubr.f32.vlgmr.msra.gmra.mxu0 %v1160_v49  ;;  %1307 = vmatmul.mubr.f32.vlgmr.msra.gmra.mxu1 %v1160_v49 }
 0x605   :  { %1353 = vmatpush1.msra.mxu0 %v2517_v63  ;;  %1424 = vmatpush1.msra.mxu1 %v2523_v55  ;;  %v3274_v63 = vld [vmem:[#allocation6_spill] sm:$0xff]  ;;  %v3275_v55 = vld [vmem:[#allocation12_spill] sm:$0xff] }
 0x606   :  { %1354 = vmatprep.subr.mxu0 %v2529_v60  ;;  %1425 = vmatprep.subr.mxu1 %v2535_v52  ;;  %v3276_v60 = vld [vmem:[#allocation7_spill] sm:$0xff]  ;;  %v3277_v52 = vld [vmem:[#allocation14_spill] sm:$0xff] }
 0x607   :  { %1355 = vmatpush1.msra.mxu0 %v2541_v0  ;;  %1426 = vmatpush1.msra.mxu1 %v2547_v59  ;;  %v3278_v0 = vld [vmem:[#allocation8_spill] sm:$0xff] }
 0x608   :  { %1356 = vmatprep.subr.mxu0 %v2553_v50  ;;  %1427 = vmatprep.subr.mxu1 %v2559_v57  ;;  %v3279_v59 = vld [vmem:[#allocation16_spill] sm:$0xff]  ;;  %v3280_v50 = vld [vmem:[#allocation9_spill] sm:$0xff] }
 0x609   :  { %1357 = vmatpush1.msra.mxu0 %v2565_v58  ;;  %1428 = vmatpush1.msra.mxu1 %v2571_v9  ;;  %v3281_v57 = vld [vmem:[#allocation17_spill] sm:$0xff]  ;;  %v3282_v58 = vld [vmem:[#allocation10_spill] sm:$0xff] }
 0x60a   :  { %1358 = vmatprep.subr.mxu0 %v2577_v61  ;;  %1429 = vmatprep.subr.mxu1 %v2583_v48  ;;  %v3283_v9 = vld [vmem:[#allocation18_spill] sm:$0xff]  ;;  %v3284_v61 = vld [vmem:[#allocation11_spill] sm:$0xff]  ;;  %v3285_v48 = vld [vmem:[#allocation20_spill] sm:$0xff] }
 0x60b   :  { %1359 = vmatpush1.msra.mxu0 %v2589_v1  ;;  %1430 = vmatpush1.msra.mxu1 %v2595_v2  ;;  %v3286_v1 = vld [vmem:[#allocation19_spill] sm:$0xff] }
 0x60c   :  { %1360 = vmatprep.subr.mxu0 %v2601_v4  ;;  %1431 = vmatprep.subr.mxu1 %v2607_v5  ;;  %v3287_v2 = vld [vmem:[#allocation15_spill] sm:$0xff]  ;;  %v3288_v4 = vld [vmem:[#allocation13_spill] sm:$0xff]  ;;  %v3289_v5 = vmov 0.0  }
 0x60d   :  { %1361 = vmatpush1.msra.mxu0 %v2613_v6  ;;  %1432 = vmatpush1.msra.mxu1 %v2619_v7  ;;  %v3290_v6 = vld [vmem:[#allocation21_spill] sm:$0xff]  ;;  %v1556_v7 = vld [vmem:[%s3090_s0 + $0xc0] sm:$0xff] }
 0x60e   :  { %1362 = vmatprep.subr.mxu0 %v2625_v8  ;;  %1433 = vmatprep.subr.mxu1 %v2631_v10  ;;  %v1557_v10 = vld [vmem:[%s3090_s0 + $0xc8] sm:$0xff] }
 0x60f   :  { %1363 = vmatpush1.msra.mxu0 %v2637_v11  ;;  %1434 = vmatpush1.msra.mxu1 %v2643_v12 }
 0x610   :  { %1364 = vmatprep.subr.mxu0 %v2649_v13  ;;  %1435 = vmatprep.subr.mxu1 %v2655_v15 }
 0x611   :  { %1365 = vmatpush1.msra.mxu0 %v2661_v17  ;;  %1436 = vmatpush1.msra.mxu1 %v2667_v22 }
 0x612   :  { %1366 = vmatprep.subr.mxu0 %v2673_v23  ;;  %1437 = vmatprep.subr.mxu1 %v2679_v24 }
 0x613   :  { %1367 = vmatpush1.msra.mxu0 %v2685_v25  ;;  %1438 = vmatpush1.msra.mxu1 %v2691_v26  ;;  %v1559_v25 = vld [vmem:[%s3090_s0 + $0xd8] sm:$0xff] }
 0x614   :  { %1368 = vmatprep.subr.mxu0 %v2697_v27  ;;  %1439 = vmatprep.subr.mxu1 %v2703_v28 }
 0x615   :  { %1369 = vmatpush1.msra.mxu0 %v2709_v29  ;;  %1440 = vmatpush1.msra.mxu1 %v2715_v30  ;;  %v1558_v29 = vld [vmem:[%s3090_s0 + $0xd0] sm:$0xff] }
 0x616   :  { %1370 = vmatprep.subr.mxu0 %v2721_v31  ;;  %1441 = vmatprep.subr.mxu1 %v2727_v32 }
 0x617   :  { %1371 = vmatpush1.msra.mxu0 %v2733_v33  ;;  %1442 = vmatpush1.msra.mxu1 %v2739_v34 }
 0x618   :  { %1372 = vmatprep.subr.mxu0 %v2745_v35  ;;  %1443 = vmatprep.subr.mxu1 %v2751_v36 }
 0x619   :  { %1373 = vmatpush1.msra.mxu0 %v2757_v37  ;;  %1444 = vmatpush1.msra.mxu1 %v2763_v38 }
 0x61a   :  { %1374 = vmatprep.subr.mxu0 %v2769_v39  ;;  %1445 = vmatprep.subr.mxu1 %v2775_v40 }
 0x61b   :  { %1375 = vmatpush1.msra.mxu0 %v2781_v41  ;;  %1446 = vmatpush1.msra.mxu1 %v2787_v42 }
 0x61c   :  { %1376 = vmatprep.subr.mxu0 %v3274_v63  ;;  %1447 = vmatprep.subr.mxu1 %v3275_v55  ;;  %v1563_v55 = vld [vmem:[%s3090_s0 + $0xf0] sm:$0xff] }
 0x61d   :  { %1377 = vmatpush1.msra.mxu0 %v3276_v60  ;;  %1448 = vmatpush1.msra.mxu1 %v3277_v52 }
 0x61e   :  { %1378 = vmatprep.subr.mxu0 %v3278_v0  ;;  %1449 = vmatprep.subr.mxu1 %v3279_v59 }
 0x61f   :  { %1379 = vmatpush1.msra.mxu0 %v3280_v50  ;;  %1450 = vmatpush1.msra.mxu1 %v3281_v57 }
 0x620   :  { %1380 = vmatprep.subr.mxu0 %v3282_v58  ;;  %1451 = vmatprep.subr.mxu1 %v3283_v9 }
 0x621   :  { %1381 = vmatpush1.msra.mxu0 %v3284_v61  ;;  %1452 = vmatpush1.msra.mxu1 %v3285_v48 }
 0x622   :  { %1382 = vmatprep.subr.mxu0 %v3286_v1  ;;  %1453 = vmatprep.subr.mxu1 %v3287_v2 }
 0x623   :  { %1383 = vmatpush1.msra.mxu0 %v3288_v4  ;;  %1416 = vmatprep.mubr.f32.mxu0 %v3289_v5 }
 0x624   :  { %1454 = vmatpush1.msra.mxu1 %v3290_v6  ;;  %1487 = vmatprep.mubr.f32.mxu1 %v3289_v5 }
 0x6c4   :  { %v1237_v8 = vpop.f32.mrf.mxu0  ;;  %v1308_v15 = vpop.f32.mrf.mxu1 }
 0x6c5   :  { %v1313_v11 = vadd.f32 %v1556_v7, %v1237_v8  ;;  %v1315_v32 = vadd.f32 %v1558_v29, %v1308_v15 }
 0x6c6   :  { %v1239_v12 = vpop.f32.mrf.mxu0  ;;  %v1310_v26 = vpop.f32.mrf.mxu1 }
 0x6c7   :  { %v1317_v13 = vsub.f32 0.0, %v1313_v11  ;;  %v1314_v17 = vadd.f32 %v1557_v10, %v1239_v12  ;;  %v1316_v27 = vadd.f32 %v1559_v25, %v1310_v26 }
 0x6c9   :  { %v1318_v22 = vmul.f32 1.442695, %v1317_v13  ;;  %v1323_v23 = vsub.f32 0.0, %v1314_v17  ;;  %v1330_v28 = vsub.f32 0.0, %v1316_v27 }
 0x6cb   :  { %1663 = vpow2.f32 %v1318_v22  ;;  %v1324_v24 = vmul.f32 1.442695, %v1323_v23  ;;  %v1331_v30 = vmul.f32 1.442695, %v1330_v28 }
 0x6cd   :  { %1665 = vpow2.f32 %v1324_v24 }
 0x6ce   :  { %1667 = vpow2.f32 %v1331_v30 }
 0x6d8   :  { %v1664_v31 = vpop.eup %1663 }
 0x6d9   :  { %v1320_v33 = vadd.f32 1.0, %v1664_v31 }
 0x6da   :  { %v1666_v34 = vpop.eup %1665 }
 0x6db   :  { %1669 = vrcp.f32 %v1320_v33  ;;  %v1326_v35 = vadd.f32 1.0, %v1666_v34  ;;  %v1668_v36 = vpop.eup %1667 }
 0x6dc   :  { %1671 = vtanh.f32 %v1315_v32  ;;  %v1333_v40 = vadd.f32 1.0, %v1668_v36 }
 0x6dd   :  { %1673 = vrcp.f32 %v1326_v35 }
 0x6de   :  { %1675 = vrcp.f32 %v1333_v40 }
 0x6e8   :  { %v1670_v37 = vpop.eup %1669 }
 0x6e9   :  { %v1672_v38 = vpop.eup %1671 }
 0x6ea   :  { %v1674_v39 = vpop.eup %1673  ;;  %v1338_v41 = vmul.f32 %v1672_v38, %v1670_v37 }
 0x6eb   :  { %v1337_v42 = vmul.f32 %v1674_v39, %v2988_v3  ;;  %v1676_v44 = vpop.eup %1675  ;;  %v1562_v3 = vld [vmem:[%s3090_s0 + $0xe8] sm:$0xff] }
 0x6ed   :  { %v1339_v43 = vadd.f32 %v1338_v41, %v1337_v42 }
 0x6ef   :  { %1677 = vtanh.f32 %v1339_v43 }
 0x6fc   :  { %v1678_v45 = vpop.eup %1677 }
 0x6fd   :  { %v1341_v19 = vmul.f32 %v1678_v45, %v1676_v44 }
 0x6ff   :  { %1560 = vst [vmem:[%s3091_s2 + $0x30] sm:$0xff] %v1341_v19  ;;  %1417 = vmatmul.mubr.f32.vlgmr.msra.gmra.mxu0 %v1341_v19  ;;  %1488 = vmatmul.mubr.f32.vlgmr.msra.gmra.mxu1 %v1341_v19 }
 0x7bf   :  { %v1418_v51 = vpop.f32.mrf.mxu0  ;;  %v1489_v14 = vpop.f32.mrf.mxu1 }
 0x7c0   :  { %v1494_v46 = vadd.f32 %v1561_v54, %v1418_v51  ;;  %v1496_v0 = vadd.f32 %v1563_v55, %v1489_v14 }
 0x7c1   :  { %v1420_v20 = vpop.f32.mrf.mxu0  ;;  %v1491_v18 = vpop.f32.mrf.mxu1 }
 0x7c2   :  { %v1498_v53 = vsub.f32 0.0, %v1494_v46  ;;  %v1495_v47 = vadd.f32 %v1562_v3, %v1420_v20  ;;  %v1497_v49 = vadd.f32 %v1564_v16, %v1491_v18 }
 0x7c4   :  { %v1499_v56 = vmul.f32 1.442695, %v1498_v53  ;;  %v1504_v62 = vsub.f32 0.0, %v1495_v47  ;;  %v1511_v63 = vsub.f32 0.0, %v1497_v49 }
 0x7c6   :  { %1679 = vpow2.f32 %v1499_v56  ;;  %v1505_v21 = vmul.f32 1.442695, %v1504_v62  ;;  %v1512_v60 = vmul.f32 1.442695, %v1511_v63 }
 0x7c8   :  { %1681 = vpow2.f32 %v1505_v21 }
 0x7c9   :  { %1683 = vpow2.f32 %v1512_v60 }
 0x7d3   :  { %v1680_v52 = vpop.eup %1679 }
 0x7d4   :  { %v1501_v59 = vadd.f32 1.0, %v1680_v52 }
 0x7d5   :  { %v1682_v50 = vpop.eup %1681 }
 0x7d6   :  { %1685 = vrcp.f32 %v1501_v59  ;;  %v1507_v57 = vadd.f32 1.0, %v1682_v50  ;;  %v1684_v58 = vpop.eup %1683 }
 0x7d7   :  { %1687 = vtanh.f32 %v1496_v0  ;;  %v1514_v1 = vadd.f32 1.0, %v1684_v58 }
 0x7d8   :  { %1689 = vrcp.f32 %v1507_v57 }
 0x7d9   :  { %1691 = vrcp.f32 %v1514_v1 }
 0x7e3   :  { %v1686_v9 = vpop.eup %1685 }
 0x7e4   :  { %v1688_v61 = vpop.eup %1687 }
 0x7e5   :  { %v1690_v48 = vpop.eup %1689  ;;  %v1519_v2 = vmul.f32 %v1688_v61, %v1686_v9 }
 0x7e6   :  { %v1518_v4 = vmul.f32 %v1690_v48, %v1339_v43  ;;  %v1692_v6 = vpop.eup %1691 }
 0x7e8   :  { %v1520_v5 = vadd.f32 %v1519_v2, %v1518_v4 }
 0x7ea   :  { %1693 = vtanh.f32 %v1520_v5 }
 0x7f7   :  { %v1694_v7 = vpop.eup %1693 }
 0x7f8   :  { %v1522_v8 = vmul.f32 %v1694_v7, %v1692_v6 }
 0x7fa   :  { %1565 = vst [vmem:[%s3091_s2 + $0x38] sm:$0xff] %v1522_v8 }

</bundles_post_ra>
